<compile_context>
chip_gen: v7x
topology: tpu7x:2x2x1
jax: 0.10.0
libtpu: 0.0.40
codegen_flags: <defaults>
</compile_context>

<pallas_src>
import math

import jax
import jax.numpy as jnp
from jax import lax
from jax.experimental import pallas as pl
from jax.experimental.pallas import tpu as pltpu

D_MODEL = 512
VOCAB = 1000
VOCAB_PAD = 1024          # pad vocab to a lane-aligned MXU contraction dim
MAX_TOK_TILE = 512        # tokens per grid step -> up to 512x512 f32 output tile (1 MiB)
SCALE = math.sqrt(D_MODEL)


def _round_up(x, m):
    return ((x + m - 1) // m) * m


def _make_emb_kernel(tok_tile):
    def _emb_kernel(ids_ref, table_ref, out_ref):
        # ids_ref:   VMEM (tok_tile, 1)         int32  (this tile's token ids)
        # table_ref: VMEM (VOCAB_PAD, D_MODEL)  f32    (constant block -> resident)
        # out_ref:   VMEM (tok_tile, D_MODEL)   f32
        ids = ids_ref[...]                                            # (tok_tile, 1)
        vocab_iota = lax.broadcasted_iota(jnp.int32, (tok_tile, VOCAB_PAD), 1)
        # One-hot with sqrt(d_model) folded in: gather + scale become one MXU matmul.
        # Ids >= VOCAB (including pad ids) match nothing -> zero output row.
        one_hot = jnp.where(vocab_iota == ids, jnp.float32(SCALE), jnp.float32(0.0))
        out_ref[...] = jnp.dot(
            one_hot, table_ref[...], preferred_element_type=jnp.float32
        ).astype(out_ref.dtype)

    return _emb_kernel


def embeddings_forward(ids, table):
    """ids: (B, S) int token ids; table: (VOCAB, D_MODEL) f32. Returns (B, S, D_MODEL) f32."""
    B, S = ids.shape
    n_tokens = B * S
    # Adaptive token tile: big (512) for real workloads, shrunk (multiple of 8)
    # for tiny inputs so we don't burn MXU flops on padding rows.
    tok_tile = min(MAX_TOK_TILE, _round_up(n_tokens, 8))
    n_pad = pl.cdiv(n_tokens, tok_tile) * tok_tile

    ids_flat = ids.reshape(n_tokens).astype(jnp.int32)
    # Pad with an out-of-vocab id so padded rows produce zeros (sliced off below).
    ids_padded = jnp.pad(
        ids_flat, (0, n_pad - n_tokens), constant_values=VOCAB_PAD
    ).reshape(n_pad, 1)
    table_padded = jnp.pad(table, ((0, VOCAB_PAD - VOCAB), (0, 0)))

    out_flat = pl.pallas_call(
        _make_emb_kernel(tok_tile),
        out_shape=jax.ShapeDtypeStruct((n_pad, D_MODEL), table.dtype),
        grid_spec=pltpu.PrefetchScalarGridSpec(
            num_scalar_prefetch=0,
            grid=(n_pad // tok_tile,),
            in_specs=[
                # per-tile token ids (disjoint blocks along the grid axis)
                pl.BlockSpec((tok_tile, 1), lambda i: (i, 0)),
                # full (padded) embedding table, constant block index -> resident in VMEM
                pl.BlockSpec((VOCAB_PAD, D_MODEL), lambda i: (0, 0)),
            ],
            out_specs=pl.BlockSpec((tok_tile, D_MODEL), lambda i: (i, 0)),
        ),
        compiler_params=pltpu.CompilerParams(
            dimension_semantics=("parallel",),
        ),
    )(ids_padded, table_padded)

    return out_flat[:n_tokens].reshape(B, S, D_MODEL)


if __name__ == "__main__":
    key = jax.random.PRNGKey(0)
    k_tab, k_ids = jax.random.split(key)

    # nn.Embedding(vocab, d_model) initializes weights ~ N(0, 1)
    table = jax.random.normal(k_tab, (VOCAB, D_MODEL), dtype=jnp.float32)

    B, S = 2, 8
    ids = jax.random.randint(k_ids, (B, S), 0, VOCAB, dtype=jnp.int32)

    out = embeddings_forward(ids, table)
    out = jax.block_until_ready(out)

    # reference check (plain JAX gather, matches PyTorch lut(x) * sqrt(d_model))
    ref = jnp.take(table, ids, axis=0) * math.sqrt(D_MODEL)
    assert out.shape == (B, S, D_MODEL)
    assert jnp.allclose(out, ref, atol=1e-5, rtol=1e-5)

    print("KERNEL_OK")
</pallas_src>

<mosaic_0001>
module attributes {stable_mosaic.version = 11 : i64} {
  func.func @_emb_kernel(%arg0: i32, %arg1: memref<16x1xi32, #tpu.memory_space<vmem>>, %arg2: memref<1024x512xf32, #tpu.memory_space<vmem>>, %arg3: memref<16x512xf32, #tpu.memory_space<vmem>>) attributes {dimension_semantics = [#tpu.dimension_semantics<parallel>], iteration_bounds = array<i64: 1>, scalar_prefetch = 0 : i64, scratch_operands = 0 : i64, tpu.core_type = #tpu.core_type<tc>, window_params = [{transform_indices = @transform_0, window_bounds = array<i64: 16, 1>}, {pipeline_mode = #tpu.pipeline_mode<synchronous>, transform_indices = @transform_1, window_bounds = array<i64: 1024, 512>}, {transform_indices = @transform_2, window_bounds = array<i64: 16, 512>}]} {
    %c0 = arith.constant 0 : index
    %c0_0 = arith.constant 0 : index
    %0 = vector.load %arg1[%c0, %c0_0] : memref<16x1xi32, #tpu.memory_space<vmem>>, vector<16x1xi32>
    %1 = tpu.iota {dimensions = array<i32: 1>} : vector<16x1024xi32>
    %2 = vector.broadcast %0 : vector<16x1xi32> to vector<16x1024xi32>
    %3 = arith.cmpi eq, %1, %2 : vector<16x1024xi32>
    %cst = arith.constant 22.6274166 : f32
    %cst_1 = arith.constant 0.000000e+00 : f32
    %4 = vector.broadcast %cst : f32 to vector<16x1024xf32>
    %5 = vector.broadcast %cst_1 : f32 to vector<16x1024xf32>
    %6 = arith.select %3, %4, %5 : vector<16x1024xi1>, vector<16x1024xf32>
    %c0_2 = arith.constant 0 : index
    %c0_3 = arith.constant 0 : index
    %7 = vector.load %arg2[%c0_2, %c0_3] : memref<1024x512xf32, #tpu.memory_space<vmem>>, vector<1024x512xf32>
    %cst_4 = arith.constant dense<0.000000e+00> : vector<16x512xf32>
    %8 = tpu.matmul %6, %7, %cst_4 {dimension_numbers = #tpu.dot_dimension_numbers<[1], [0], [0], [1], [0, 0, 1, 1], [], []>} : vector<16x1024xf32>, vector<1024x512xf32>, vector<16x512xf32> -> vector<16x512xf32>
    %c0_5 = arith.constant 0 : index
    %c0_6 = arith.constant 0 : index
    %9 = vector.load %arg3[%c0_5, %c0_6] : memref<16x512xf32, #tpu.memory_space<vmem>>, vector<16x512xf32>
    tpu.vector_store %arg3[%c0_5, %c0_6], %8 {strides = array<i32>} : memref<16x512xf32, #tpu.memory_space<vmem>>, vector<16x512xf32>,
    return
  }
  func.func @transform_0(%arg0: i32) -> (i32, i32) {
    %c0_i32 = arith.constant 0 : i32
    %c0_i32_0 = arith.constant 0 : i32
    return %arg0, %c0_i32 : i32, i32
  }
  func.func @transform_1(%arg0: i32) -> (i32, i32) {
    %c0_i32 = arith.constant 0 : i32
    %c0_i32_0 = arith.constant 0 : i32
    %c0_i32_1 = arith.constant 0 : i32
    return %c0_i32, %c0_i32_0 : i32, i32
  }
  func.func @transform_2(%arg0: i32) -> (i32, i32) {
    %c0_i32 = arith.constant 0 : i32
    %c0_i32_0 = arith.constant 0 : i32
    return %arg0, %c0_i32 : i32, i32
  }
}

</mosaic_0001>

<bundles_post_ra>
// kernel: tpu_custom_call.1
= control target key start
LH: loop header
LB: loop body
LE: loop exit
PB: predicated region body
PF: predicated region fallthrough
CT: control target
= control target key end

     0   :  { %7 = vsyncpa [#allocation3], 0  ;;  %s1983_s0 = inlined_call_operand.vmem [shape: s32[16,1], index: 0, kind: input, shape index: {}]   ;;  %s1984_s1 = inlined_call_operand.hbm [shape: f32[1024,512], index: 1, kind: input, shape index: {}]   ;;  %s1985_s2 = inlined_call_operand.hbm [shape: f32[16,512], index: 2, kind: output, shape index: {}]  }
   0x1   :  { %8 = vsyncpa [#allocation4], 0  ;;  %s1851_s9 = smov [#allocation2]   ;;  %s1803_s13 = scalar_lea.hbm %s1984_s1, 65536 }
   0x2   :  { %s16_s10 = sshll.u32 %s1851_s9, 4  ;;  %p1804_p0 = scmp.ne.s32.totalorder %s1984_s1, %s1803_s13  ;;  %s17_s10 = int_to_ptr.vmem [resolvable:$true] %s16_s10 }
   0x3   :  { %p1807_p1 = scmp.lt.u32.totalorder %s1803_s13, %s1984_s1 }
   0x5   :  { %p1809_p2 = pnand %p1807_p1, %p1804_p0 }
   0x7   :  { %1812 = shalt.err (!%p1809_p2)
}
   0x8   :  { %s1813_s18 = scalar_lea.vmem %s17_s10, 65536  ;;  %p1818_p4 = scmp.lt.s32.totalorder %s17_s10, %s17_s10 }
   0x9   :  { %p1814_p3 = scmp.ne.s32.totalorder %s17_s10, %s1813_s18  ;;  %p1819_p5 = scmp.lt.s32.totalorder %s1813_s18, %s1813_s18 }
   0xb   :  { %p1820_p6 = por %p1819_p5, %p1818_p4 }
   0xd   :  { %p1821_p7 = pnand %p1820_p6, %p1814_p3 }
   0xf   :  { %1824 = shalt.err (!%p1821_p7)
}
  0x10   :  { %s1852_s19 = smov 512   ;;  %s1853_s20 = smov 32  }
  0x11   :  { %22 = dma.hbm_to_vmem [thread:$0]  %s1984_s1, 65536, %s17_s10, [#allocation3], %s1852_s19, %s1852_s19, %s1853_s20  }
  0x12   :  { %1847 = dma.done.wait [#allocation3], 65536  }
  0x13   :  { %1848 = vsyncadd [#allocation3], 4294901760  ;;  %v1854_v0 = vmov 0   ;;  %v26_v1 = vld [vmem:[%s1983_s0] sm:$0xff]  ;;  %v27_v2 = vld [vmem:[%s1983_s0 + $0x8] sm:$0xff]  ;;  %s1856_s0 = smov [#allocation5]  }
  0x14   :  { %1802 = vset.pattern.permute.xlu0 %v1854_v0  ;;  %v76_v3 = vld [vmem:[#allocation2 + $0x8] sm:$0xff]  ;;  %v78_v5 = vld [vmem:[#allocation2 + $0x18] sm:$0xff]  ;;  %v75_v9 = vld [vmem:[#allocation2] sm:$0xff]  ;;  %s1216_s1 = sshll.u32 %s1856_s0, 4  ;;  %s1217_s1 = int_to_ptr.vmem [resolvable:$true] %s1216_s1 }
  0x15   :  { %38 = vperm.xlu0 %1802, %v26_v1   ;;  %v80_v4 = vld [vmem:[#allocation2 + $0x28] sm:$0xff]  ;;  %v82_v6 = vld [vmem:[#allocation2 + $0x38] sm:$0xff]  ;;  %v79_v10 = vld [vmem:[#allocation2 + $0x20] sm:$0xff]  ;;  %s1825_s27 = scalar_lea.vmem %s1217_s1, 1024  ;;  %p1830_p9 = scmp.lt.s32.totalorder %s1217_s1, %s1217_s1 }
  0x16   :  { %v1260_v7 = vpack.c.bf16 %v80_v4, %v76_v3  ;;  %v1516_v8 = vpack.c.bf16 %v82_v6, %v78_v5  ;;  %v77_v11 = vld [vmem:[#allocation2 + $0x10] sm:$0xff]  ;;  %v1262_v12 = vpack.c.bf16 %v79_v10, %v75_v9  ;;  %v84_v14 = vld [vmem:[#allocation2 + $0x48] sm:$0xff]  ;;  %v86_v18 = vld [vmem:[#allocation2 + $0x58] sm:$0xff]  ;;  %p1826_p8 = scmp.ne.s32.totalorder %s1217_s1, %s1825_s27  ;;  %p1831_p10 = scmp.lt.s32.totalorder %s1825_s27, %s1825_s27 }
  0x17   :  { %v81_v13 = vld [vmem:[#allocation2 + $0x30] sm:$0xff]  ;;  %v88_v15 = vld [vmem:[#allocation2 + $0x68] sm:$0xff]  ;;  %v90_v19 = vld [vmem:[#allocation2 + $0x78] sm:$0xff] }
  0x18   :  { %1261 = vmatprep.subr.bf16.mxu0 %v1260_v7  ;;  %1517 = vmatprep.subr.bf16.mxu1 %v1516_v8  ;;  %v1518_v16 = vpack.c.bf16 %v81_v13, %v77_v11  ;;  %v1264_v17 = vpack.c.bf16 %v88_v15, %v84_v14  ;;  %v83_v20 = vld [vmem:[#allocation2 + $0x40] sm:$0xff]  ;;  %v1520_v21 = vpack.c.bf16 %v90_v19, %v86_v18  ;;  %v85_v23 = vld [vmem:[#allocation2 + $0x50] sm:$0xff]  ;;  %v92_v27 = vld [vmem:[#allocation2 + $0x88] sm:$0xff]  ;;  %p1832_p11 = por %p1831_p10, %p1830_p9 }
  0x19   :  { %41 = vperm.xlu0 %1802, %v27_v2   ;;  %1263 = vmatpush1.bf16.msra.mxu0 %v1262_v12  ;;  %v87_v22 = vld [vmem:[#allocation2 + $0x60] sm:$0xff]  ;;  %v89_v24 = vld [vmem:[#allocation2 + $0x70] sm:$0xff]  ;;  %v96_v28 = vld [vmem:[#allocation2 + $0xa8] sm:$0xff] }
  0x1a   :  { %1519 = vmatpush1.bf16.msra.mxu1 %v1518_v16  ;;  %1265 = vmatprep.subr.bf16.mxu0 %v1264_v17  ;;  %v1266_v25 = vpack.c.bf16 %v87_v22, %v83_v20  ;;  %v1522_v26 = vpack.c.bf16 %v89_v24, %v85_v23  ;;  %v94_v29 = vld [vmem:[#allocation2 + $0x98] sm:$0xff]  ;;  %v1268_v30 = vpack.c.bf16 %v96_v28, %v92_v27  ;;  %v91_v32 = vld [vmem:[#allocation2 + $0x80] sm:$0xff]  ;;  %v93_v35 = vld [vmem:[#allocation2 + $0x90] sm:$0xff]  ;;  %p1833_p12 = pnand %p1832_p11, %p1826_p8 }
  0x1b   :  { %1521 = vmatprep.subr.bf16.mxu1 %v1520_v21  ;;  %v98_v31 = vld [vmem:[#allocation2 + $0xb8] sm:$0xff]  ;;  %v95_v33 = vld [vmem:[#allocation2 + $0xa0] sm:$0xff]  ;;  %v97_v36 = vld [vmem:[#allocation2 + $0xb0] sm:$0xff] }
  0x1c   :  { %v1524_v34 = vpack.c.bf16 %v98_v31, %v94_v29  ;;  %v100_v37 = vld [vmem:[#allocation2 + $0xc8] sm:$0xff]  ;;  %v1270_v38 = vpack.c.bf16 %v95_v33, %v91_v32  ;;  %v102_v40 = vld [vmem:[#allocation2 + $0xd8] sm:$0xff]  ;;  %v1526_v42 = vpack.c.bf16 %v97_v36, %v93_v35  ;;  %v99_v44 = vld [vmem:[#allocation2 + $0xc0] sm:$0xff] }
  0x1d   :  { %1267 = vmatpush1.bf16.msra.mxu0 %v1266_v25  ;;  %v104_v39 = vld [vmem:[#allocation2 + $0xe8] sm:$0xff]  ;;  %v106_v41 = vld [vmem:[#allocation2 + $0xf8] sm:$0xff]  ;;  %v103_v45 = vld [vmem:[#allocation2 + $0xe0] sm:$0xff] }
  0x1e   :  { %1523 = vmatpush1.bf16.msra.mxu1 %v1522_v26  ;;  %1269 = vmatprep.subr.bf16.mxu0 %v1268_v30  ;;  %v1272_v43 = vpack.c.bf16 %v104_v39, %v100_v37  ;;  %v101_v46 = vld [vmem:[#allocation2 + $0xd0] sm:$0xff]  ;;  %v1528_v47 = vpack.c.bf16 %v106_v41, %v102_v40  ;;  %v108_v49 = vld [vmem:[#allocation2 + $0x108] sm:$0xff]  ;;  %v110_v51 = vld [vmem:[#allocation2 + $0x118] sm:$0xff]  ;;  %v1274_v53 = vpack.c.bf16 %v103_v45, %v99_v44 }
  0x1f   :  { %1525 = vmatprep.subr.bf16.mxu1 %v1524_v34  ;;  %v105_v48 = vld [vmem:[#allocation2 + $0xf0] sm:$0xff]  ;;  %v112_v50 = vld [vmem:[#allocation2 + $0x128] sm:$0xff]  ;;  %v114_v52 = vld [vmem:[#allocation2 + $0x138] sm:$0xff] }
  0x20   :  { %v1530_v54 = vpack.c.bf16 %v105_v48, %v101_v46  ;;  %v1276_v55 = vpack.c.bf16 %v112_v50, %v108_v49  ;;  %v107_v56 = vld [vmem:[#allocation2 + $0x100] sm:$0xff]  ;;  %v109_v58 = vld [vmem:[#allocation2 + $0x110] sm:$0xff]  ;;  %v1532_v59 = vpack.c.bf16 %v114_v52, %v110_v51  ;;  %v116_v61 = vld [vmem:[#allocation2 + $0x148] sm:$0xff] }
  0x21   :  { %1271 = vmatpush1.bf16.msra.mxu0 %v1270_v38  ;;  %v111_v57 = vld [vmem:[#allocation2 + $0x120] sm:$0xff]  ;;  %v113_v60 = vld [vmem:[#allocation2 + $0x130] sm:$0xff]  ;;  %v120_v62 = vld [vmem:[#allocation2 + $0x168] sm:$0xff] }
  0x22   :  { %1527 = vmatpush1.bf16.msra.mxu1 %v1526_v42  ;;  %1273 = vmatprep.subr.bf16.mxu0 %v1272_v43  ;;  %v118_v63 = vld [vmem:[#allocation2 + $0x158] sm:$0xff]  ;;  %v1278_v1 = vpack.c.bf16 %v111_v57, %v107_v56  ;;  %v1534_v2 = vpack.c.bf16 %v113_v60, %v109_v58  ;;  %v1280_v3 = vpack.c.bf16 %v120_v62, %v116_v61  ;;  %v115_v4 = vld [vmem:[#allocation2 + $0x140] sm:$0xff]  ;;  %v117_v6 = vld [vmem:[#allocation2 + $0x150] sm:$0xff] }
  0x23   :  { %1529 = vmatprep.subr.bf16.mxu1 %v1528_v47  ;;  %v122_v0 = vld [vmem:[#allocation2 + $0x178] sm:$0xff]  ;;  %v119_v5 = vld [vmem:[#allocation2 + $0x160] sm:$0xff]  ;;  %v121_v8 = vld [vmem:[#allocation2 + $0x170] sm:$0xff] }
  0x24   :  { %v1536_v7 = vpack.c.bf16 %v122_v0, %v118_v63  ;;  %v124_v9 = vld [vmem:[#allocation2 + $0x188] sm:$0xff]  ;;  %v126_v11 = vld [vmem:[#allocation2 + $0x198] sm:$0xff]  ;;  %v1282_v13 = vpack.c.bf16 %v119_v5, %v115_v4  ;;  %v1538_v14 = vpack.c.bf16 %v121_v8, %v117_v6  ;;  %v123_v16 = vld [vmem:[#allocation2 + $0x180] sm:$0xff] }
  0x25   :  { %1275 = vmatpush1.bf16.msra.mxu0 %v1274_v53  ;;  %v128_v10 = vld [vmem:[#allocation2 + $0x1a8] sm:$0xff]  ;;  %v130_v12 = vld [vmem:[#allocation2 + $0x1b8] sm:$0xff]  ;;  %v127_v17 = vld [vmem:[#allocation2 + $0x1a0] sm:$0xff] }
  0x26   :  { %1531 = vmatpush1.bf16.msra.mxu1 %v1530_v54  ;;  %1277 = vmatprep.subr.bf16.mxu0 %v1276_v55  ;;  %v1284_v15 = vpack.c.bf16 %v128_v10, %v124_v9  ;;  %v125_v18 = vld [vmem:[#allocation2 + $0x190] sm:$0xff]  ;;  %v1540_v19 = vpack.c.bf16 %v130_v12, %v126_v11  ;;  %v132_v21 = vld [vmem:[#allocation2 + $0x1c8] sm:$0xff]  ;;  %v134_v23 = vld [vmem:[#allocation2 + $0x1d8] sm:$0xff]  ;;  %v1286_v25 = vpack.c.bf16 %v127_v17, %v123_v16 }
  0x27   :  { %1533 = vmatprep.subr.bf16.mxu1 %v1532_v59  ;;  %v129_v20 = vld [vmem:[#allocation2 + $0x1b0] sm:$0xff]  ;;  %v136_v22 = vld [vmem:[#allocation2 + $0x1e8] sm:$0xff]  ;;  %v138_v24 = vld [vmem:[#allocation2 + $0x1f8] sm:$0xff] }
  0x28   :  { %v1542_v26 = vpack.c.bf16 %v129_v20, %v125_v18  ;;  %v1288_v27 = vpack.c.bf16 %v136_v22, %v132_v21  ;;  %v131_v28 = vld [vmem:[#allocation2 + $0x1c0] sm:$0xff]  ;;  %v133_v30 = vld [vmem:[#allocation2 + $0x1d0] sm:$0xff]  ;;  %v1544_v31 = vpack.c.bf16 %v138_v24, %v134_v23  ;;  %v140_v33 = vld [vmem:[#allocation2 + $0x208] sm:$0xff] }
  0x29   :  { %1279 = vmatpush1.bf16.msra.mxu0 %v1278_v1  ;;  %v135_v29 = vld [vmem:[#allocation2 + $0x1e0] sm:$0xff]  ;;  %v137_v32 = vld [vmem:[#allocation2 + $0x1f0] sm:$0xff]  ;;  %v144_v34 = vld [vmem:[#allocation2 + $0x228] sm:$0xff] }
  0x2a   :  { %1535 = vmatpush1.bf16.msra.mxu1 %v1534_v2  ;;  %1281 = vmatprep.subr.bf16.mxu0 %v1280_v3  ;;  %v142_v35 = vld [vmem:[#allocation2 + $0x218] sm:$0xff]  ;;  %v1290_v37 = vpack.c.bf16 %v135_v29, %v131_v28  ;;  %v1546_v38 = vpack.c.bf16 %v137_v32, %v133_v30  ;;  %v1292_v39 = vpack.c.bf16 %v144_v34, %v140_v33  ;;  %v139_v40 = vld [vmem:[#allocation2 + $0x200] sm:$0xff]  ;;  %v141_v42 = vld [vmem:[#allocation2 + $0x210] sm:$0xff] }
  0x2b   :  { %1537 = vmatprep.subr.bf16.mxu1 %v1536_v7  ;;  %v146_v36 = vld [vmem:[#allocation2 + $0x238] sm:$0xff]  ;;  %v143_v41 = vld [vmem:[#allocation2 + $0x220] sm:$0xff]  ;;  %v145_v44 = vld [vmem:[#allocation2 + $0x230] sm:$0xff] }
  0x2c   :  { %v1548_v43 = vpack.c.bf16 %v146_v36, %v142_v35  ;;  %v148_v45 = vld [vmem:[#allocation2 + $0x248] sm:$0xff]  ;;  %v150_v47 = vld [vmem:[#allocation2 + $0x258] sm:$0xff]  ;;  %v1294_v49 = vpack.c.bf16 %v143_v41, %v139_v40  ;;  %v1550_v50 = vpack.c.bf16 %v145_v44, %v141_v42  ;;  %v147_v52 = vld [vmem:[#allocation2 + $0x240] sm:$0xff] }
  0x2d   :  { %1283 = vmatpush1.bf16.msra.mxu0 %v1282_v13  ;;  %v152_v46 = vld [vmem:[#allocation2 + $0x268] sm:$0xff]  ;;  %v154_v48 = vld [vmem:[#allocation2 + $0x278] sm:$0xff]  ;;  %v151_v53 = vld [vmem:[#allocation2 + $0x260] sm:$0xff] }
  0x2e   :  { %1539 = vmatpush1.bf16.msra.mxu1 %v1538_v14  ;;  %1285 = vmatprep.subr.bf16.mxu0 %v1284_v15  ;;  %v1296_v51 = vpack.c.bf16 %v152_v46, %v148_v45  ;;  %v149_v54 = vld [vmem:[#allocation2 + $0x250] sm:$0xff]  ;;  %v1552_v55 = vpack.c.bf16 %v154_v48, %v150_v47  ;;  %v156_v57 = vld [vmem:[#allocation2 + $0x288] sm:$0xff]  ;;  %v158_v59 = vld [vmem:[#allocation2 + $0x298] sm:$0xff]  ;;  %v1298_v61 = vpack.c.bf16 %v151_v53, %v147_v52 }
  0x2f   :  { %1541 = vmatprep.subr.bf16.mxu1 %v1540_v19  ;;  %v153_v56 = vld [vmem:[#allocation2 + $0x270] sm:$0xff]  ;;  %v160_v58 = vld [vmem:[#allocation2 + $0x2a8] sm:$0xff]  ;;  %v162_v60 = vld [vmem:[#allocation2 + $0x2b8] sm:$0xff] }
  0x30   :  { %v1554_v62 = vpack.c.bf16 %v153_v56, %v149_v54  ;;  %v1300_v63 = vpack.c.bf16 %v160_v58, %v156_v57  ;;  %v155_v0 = vld [vmem:[#allocation2 + $0x280] sm:$0xff]  ;;  %v157_v2 = vld [vmem:[#allocation2 + $0x290] sm:$0xff]  ;;  %v1556_v3 = vpack.c.bf16 %v162_v60, %v158_v59  ;;  %v164_v5 = vld [vmem:[#allocation2 + $0x2c8] sm:$0xff] }
  0x31   :  { %1287 = vmatpush1.bf16.msra.mxu0 %v1286_v25  ;;  %v159_v1 = vld [vmem:[#allocation2 + $0x2a0] sm:$0xff]  ;;  %v161_v4 = vld [vmem:[#allocation2 + $0x2b0] sm:$0xff]  ;;  %v168_v6 = vld [vmem:[#allocation2 + $0x2e8] sm:$0xff] }
  0x32   :  { %1543 = vmatpush1.bf16.msra.mxu1 %v1542_v26  ;;  %1289 = vmatprep.subr.bf16.mxu0 %v1288_v27  ;;  %v166_v7 = vld [vmem:[#allocation2 + $0x2d8] sm:$0xff]  ;;  %v1302_v9 = vpack.c.bf16 %v159_v1, %v155_v0  ;;  %v1558_v10 = vpack.c.bf16 %v161_v4, %v157_v2  ;;  %v1304_v11 = vpack.c.bf16 %v168_v6, %v164_v5  ;;  %v163_v12 = vld [vmem:[#allocation2 + $0x2c0] sm:$0xff]  ;;  %v165_v14 = vld [vmem:[#allocation2 + $0x2d0] sm:$0xff] }
  0x33   :  { %1545 = vmatprep.subr.bf16.mxu1 %v1544_v31  ;;  %v170_v8 = vld [vmem:[#allocation2 + $0x2f8] sm:$0xff]  ;;  %v167_v13 = vld [vmem:[#allocation2 + $0x2e0] sm:$0xff]  ;;  %v169_v16 = vld [vmem:[#allocation2 + $0x2f0] sm:$0xff] }
  0x34   :  { %v1560_v15 = vpack.c.bf16 %v170_v8, %v166_v7  ;;  %v172_v17 = vld [vmem:[#allocation2 + $0x308] sm:$0xff]  ;;  %v174_v19 = vld [vmem:[#allocation2 + $0x318] sm:$0xff]  ;;  %v1306_v21 = vpack.c.bf16 %v167_v13, %v163_v12  ;;  %v1562_v22 = vpack.c.bf16 %v169_v16, %v165_v14  ;;  %v171_v24 = vld [vmem:[#allocation2 + $0x300] sm:$0xff] }
  0x35   :  { %1291 = vmatpush1.bf16.msra.mxu0 %v1290_v37  ;;  %v176_v18 = vld [vmem:[#allocation2 + $0x328] sm:$0xff]  ;;  %v178_v20 = vld [vmem:[#allocation2 + $0x338] sm:$0xff]  ;;  %v175_v25 = vld [vmem:[#allocation2 + $0x320] sm:$0xff] }
  0x36   :  { %1547 = vmatpush1.bf16.msra.mxu1 %v1546_v38  ;;  %1293 = vmatprep.subr.bf16.mxu0 %v1292_v39  ;;  %v1308_v23 = vpack.c.bf16 %v176_v18, %v172_v17  ;;  %v173_v26 = vld [vmem:[#allocation2 + $0x310] sm:$0xff]  ;;  %v1564_v27 = vpack.c.bf16 %v178_v20, %v174_v19  ;;  %v180_v29 = vld [vmem:[#allocation2 + $0x348] sm:$0xff]  ;;  %v182_v31 = vld [vmem:[#allocation2 + $0x358] sm:$0xff]  ;;  %v1310_v33 = vpack.c.bf16 %v175_v25, %v171_v24 }
  0x37   :  { %1549 = vmatprep.subr.bf16.mxu1 %v1548_v43  ;;  %v177_v28 = vld [vmem:[#allocation2 + $0x330] sm:$0xff]  ;;  %v184_v30 = vld [vmem:[#allocation2 + $0x368] sm:$0xff]  ;;  %v186_v32 = vld [vmem:[#allocation2 + $0x378] sm:$0xff] }
  0x38   :  { %v1566_v34 = vpack.c.bf16 %v177_v28, %v173_v26  ;;  %v1312_v35 = vpack.c.bf16 %v184_v30, %v180_v29  ;;  %v179_v36 = vld [vmem:[#allocation2 + $0x340] sm:$0xff]  ;;  %v181_v38 = vld [vmem:[#allocation2 + $0x350] sm:$0xff]  ;;  %v1568_v39 = vpack.c.bf16 %v186_v32, %v182_v31  ;;  %v188_v41 = vld [vmem:[#allocation2 + $0x388] sm:$0xff]  ;;  %v1855_v29 = vmov 22.627417  }
  0x39   :  { %1295 = vmatpush1.bf16.msra.mxu0 %v1294_v49  ;;  %v183_v37 = vld [vmem:[#allocation2 + $0x360] sm:$0xff]  ;;  %v185_v40 = vld [vmem:[#allocation2 + $0x370] sm:$0xff]  ;;  %v192_v42 = vld [vmem:[#allocation2 + $0x3a8] sm:$0xff] }
  0x3a   :  { %1551 = vmatpush1.bf16.msra.mxu1 %v1550_v50  ;;  %1297 = vmatprep.subr.bf16.mxu0 %v1296_v51  ;;  %v190_v43 = vld [vmem:[#allocation2 + $0x398] sm:$0xff]  ;;  %v1314_v45 = vpack.c.bf16 %v183_v37, %v179_v36  ;;  %v1570_v46 = vpack.c.bf16 %v185_v40, %v181_v38  ;;  %v1316_v47 = vpack.c.bf16 %v192_v42, %v188_v41  ;;  %v187_v48 = vld [vmem:[#allocation2 + $0x380] sm:$0xff]  ;;  %v189_v50 = vld [vmem:[#allocation2 + $0x390] sm:$0xff] }
  0x3b   :  { %1553 = vmatprep.subr.bf16.mxu1 %v1552_v55  ;;  %v194_v44 = vld [vmem:[#allocation2 + $0x3b8] sm:$0xff]  ;;  %v191_v49 = vld [vmem:[#allocation2 + $0x3a0] sm:$0xff]  ;;  %v193_v52 = vld [vmem:[#allocation2 + $0x3b0] sm:$0xff] }
  0x3c   :  { %v1572_v51 = vpack.c.bf16 %v194_v44, %v190_v43  ;;  %v196_v53 = vld [vmem:[#allocation2 + $0x3c8] sm:$0xff]  ;;  %v198_v55 = vld [vmem:[#allocation2 + $0x3d8] sm:$0xff]  ;;  %v1318_v57 = vpack.c.bf16 %v191_v49, %v187_v48  ;;  %v1574_v58 = vpack.c.bf16 %v193_v52, %v189_v50  ;;  %v195_v60 = vld [vmem:[#allocation2 + $0x3c0] sm:$0xff] }
  0x3d   :  { %1299 = vmatpush1.bf16.msra.mxu0 %v1298_v61  ;;  %v200_v54 = vld [vmem:[#allocation2 + $0x3e8] sm:$0xff]  ;;  %v202_v56 = vld [vmem:[#allocation2 + $0x3f8] sm:$0xff]  ;;  %v199_v61 = vld [vmem:[#allocation2 + $0x3e0] sm:$0xff] }
  0x3e   :  { %1555 = vmatpush1.bf16.msra.mxu1 %v1554_v62  ;;  %1301 = vmatprep.subr.bf16.mxu0 %v1300_v63  ;;  %v1320_v59 = vpack.c.bf16 %v200_v54, %v196_v53  ;;  %v197_v62 = vld [vmem:[#allocation2 + $0x3d0] sm:$0xff]  ;;  %v1576_v63 = vpack.c.bf16 %v202_v56, %v198_v55  ;;  %v204_v1 = vld [vmem:[#allocation2 + $0x408] sm:$0xff]  ;;  %v210_v4 = vld [vmem:[#allocation2 + $0x438] sm:$0xff]  ;;  %v1322_v5 = vpack.c.bf16 %v199_v61, %v195_v60 }
  0x3f   :  { %1557 = vmatprep.subr.bf16.mxu1 %v1556_v3  ;;  %v201_v0 = vld [vmem:[#allocation2 + $0x3f0] sm:$0xff]  ;;  %v208_v2 = vld [vmem:[#allocation2 + $0x428] sm:$0xff]  ;;  %v206_v3 = vld [vmem:[#allocation2 + $0x418] sm:$0xff] }
  0x40   :  { %v1578_v6 = vpack.c.bf16 %v201_v0, %v197_v62  ;;  %v1324_v7 = vpack.c.bf16 %v208_v2, %v204_v1  ;;  %v1580_v8 = vpack.c.bf16 %v210_v4, %v206_v3  ;;  %v207_v12 = vld [vmem:[#allocation2 + $0x420] sm:$0xff]  ;;  %v205_v14 = vld [vmem:[#allocation2 + $0x410] sm:$0xff]  ;;  %v212_v16 = vld [vmem:[#allocation2 + $0x448] sm:$0xff] }
  0x41   :  { %1303 = vmatpush1.bf16.msra.mxu0 %v1302_v9  ;;  %v28_v9 = vlaneseq  ;;  %v216_v17 = vld [vmem:[#allocation2 + $0x468] sm:$0xff]  ;;  %v214_v18 = vld [vmem:[#allocation2 + $0x458] sm:$0xff]  ;;  %v215_v26 = vld [vmem:[#allocation2 + $0x460] sm:$0xff] }
  0x42   :  { %1559 = vmatpush1.bf16.msra.mxu1 %v1558_v10  ;;  %1305 = vmatprep.subr.bf16.mxu0 %v1304_v11  ;;  %v203_v11 = vld [vmem:[#allocation2 + $0x400] sm:$0xff]  ;;  %v218_v19 = vld [vmem:[#allocation2 + $0x478] sm:$0xff]  ;;  %v1328_v24 = vpack.c.bf16 %v216_v17, %v212_v16  ;;  %v217_v28 = vld [vmem:[#allocation2 + $0x470] sm:$0xff] }
  0x43   :  { %1561 = vmatprep.subr.bf16.mxu1 %v1560_v15  ;;  %v1893_v10 = vand.u32 127, %v28_v9  ;;  %v209_v15 = vld [vmem:[#allocation2 + $0x430] sm:$0xff]  ;;  %v1584_v25 = vpack.c.bf16 %v218_v19, %v214_v18  ;;  %v220_v30 = vld [vmem:[#allocation2 + $0x488] sm:$0xff]  ;;  %v222_v32 = vld [vmem:[#allocation2 + $0x498] sm:$0xff] }
  0x44   :  { %v224_v31 = vld [vmem:[#allocation2 + $0x4a8] sm:$0xff]  ;;  %v219_v38 = vld [vmem:[#allocation2 + $0x480] sm:$0xff]  ;;  %v221_v40 = vld [vmem:[#allocation2 + $0x490] sm:$0xff] }
  0x45   :  { %1307 = vmatpush1.bf16.msra.mxu0 %v1306_v21  ;;  %v30_v13 = vadd.s32 128, %v1893_v10  ;;  %v1326_v21 = vpack.c.bf16 %v207_v12, %v203_v11  ;;  %v1908_v37 = vadd.s32 384, %v1893_v10  ;;  %v225_v41 = vld [vmem:[#allocation2 + $0x4b0] sm:$0xff]  ;;  %v228_v42 = vld [vmem:[#allocation2 + $0x4c8] sm:$0xff]  ;;  %v1332_v43 = vpack.c.bf16 %v224_v31, %v220_v30  ;;  %v227_v50 = vld [vmem:[#allocation2 + $0x4c0] sm:$0xff] }
  0x46   :  { %1563 = vmatpush1.bf16.msra.mxu1 %v1562_v22  ;;  %1309 = vmatprep.subr.bf16.mxu0 %v1308_v23  ;;  %v1582_v22 = vpack.c.bf16 %v209_v15, %v205_v14  ;;  %v211_v23 = vld [vmem:[#allocation2 + $0x440] sm:$0xff]  ;;  %v1590_v49 = vpack.c.bf16 %v225_v41, %v221_v40  ;;  %v229_v54 = vld [vmem:[#allocation2 + $0x4d0] sm:$0xff]  ;;  %v236_v56 = vld [vmem:[#allocation2 + $0x508] sm:$0xff] }
  0x47   :  { %1565 = vmatprep.subr.bf16.mxu1 %v1564_v27  ;;  %v213_v27 = vld [vmem:[#allocation2 + $0x450] sm:$0xff]  ;;  %v235_v62 = vld [vmem:[#allocation2 + $0x500] sm:$0xff]  ;;  %v244_v4 = vld [vmem:[#allocation2 + $0x548] sm:$0xff] }
  0x48   :  { %v1586_v36 = vpack.c.bf16 %v217_v28, %v213_v27  ;;  %v233_v55 = vld [vmem:[#allocation2 + $0x4f0] sm:$0xff]  ;;  %v243_v11 = vld [vmem:[#allocation2 + $0x540] sm:$0xff]  ;;  %v252_v17 = vld [vmem:[#allocation2 + $0x588] sm:$0xff] }
  0x49   :  { %1311 = vmatpush1.bf16.msra.mxu0 %v1310_v33  ;;  %v226_v33 = vld [vmem:[#allocation2 + $0x4b8] sm:$0xff]  ;;  %v1594_v61 = vpack.c.bf16 %v233_v55, %v229_v54  ;;  %v237_v2 = vld [vmem:[#allocation2 + $0x510] sm:$0xff]  ;;  %v247_v12 = vld [vmem:[#allocation2 + $0x560] sm:$0xff] }
  0x4a   :  { %1567 = vmatpush1.bf16.msra.mxu1 %v1566_v34  ;;  %1313 = vmatprep.subr.bf16.mxu0 %v1312_v35  ;;  %v1330_v35 = vpack.c.bf16 %v215_v26, %v211_v23  ;;  %v1588_v44 = vpack.c.bf16 %v226_v33, %v222_v32  ;;  %v241_v3 = vld [vmem:[#allocation2 + $0x530] sm:$0xff]  ;;  %v256_v18 = vld [vmem:[#allocation2 + $0x5a8] sm:$0xff]  ;;  %v254_v19 = vld [vmem:[#allocation2 + $0x598] sm:$0xff] }
  0x4b   :  { %1569 = vmatprep.subr.bf16.mxu1 %v1568_v39  ;;  %v223_v39 = vld [vmem:[#allocation2 + $0x4a0] sm:$0xff]  ;;  %v1598_v9 = vpack.c.bf16 %v241_v3, %v237_v2  ;;  %v245_v15 = vld [vmem:[#allocation2 + $0x550] sm:$0xff]  ;;  %v1348_v26 = vpack.c.bf16 %v256_v18, %v252_v17  ;;  %v260_v31 = vld [vmem:[#allocation2 + $0x5c8] sm:$0xff] }
  0x4c   :  { %v1334_v48 = vpack.c.bf16 %v223_v39, %v219_v38  ;;  %v249_v16 = vld [vmem:[#allocation2 + $0x570] sm:$0xff]  ;;  %v264_v32 = vld [vmem:[#allocation2 + $0x5e8] sm:$0xff]  ;;  %v262_v33 = vld [vmem:[#allocation2 + $0x5d8] sm:$0xff] }
  0x4d   :  { %1315 = vmatpush1.bf16.msra.mxu0 %v1314_v45  ;;  %v232_v45 = vld [vmem:[#allocation2 + $0x4e8] sm:$0xff]  ;;  %v1602_v23 = vpack.c.bf16 %v249_v16, %v245_v15  ;;  %v253_v28 = vld [vmem:[#allocation2 + $0x590] sm:$0xff]  ;;  %v259_v39 = vld [vmem:[#allocation2 + $0x5c0] sm:$0xff]  ;;  %v1352_v41 = vpack.c.bf16 %v264_v32, %v260_v31 }
  0x4e   :  { %1571 = vmatpush1.bf16.msra.mxu1 %v1570_v46  ;;  %1317 = vmatprep.subr.bf16.mxu0 %v1316_v47  ;;  %v230_v46 = vld [vmem:[#allocation2 + $0x4d8] sm:$0xff]  ;;  %v1336_v52 = vpack.c.bf16 %v232_v45, %v228_v42  ;;  %v257_v30 = vld [vmem:[#allocation2 + $0x5b0] sm:$0xff]  ;;  %v263_v40 = vld [vmem:[#allocation2 + $0x5e0] sm:$0xff] }
  0x4f   :  { %1573 = vmatprep.subr.bf16.mxu1 %v1572_v51  ;;  %v234_v47 = vld [vmem:[#allocation2 + $0x4f8] sm:$0xff]  ;;  %v231_v51 = vld [vmem:[#allocation2 + $0x4e0] sm:$0xff]  ;;  %v1606_v38 = vpack.c.bf16 %v257_v30, %v253_v28  ;;  %v268_v45 = vld [vmem:[#allocation2 + $0x608] sm:$0xff] }
  0x50   :  { %v1592_v53 = vpack.c.bf16 %v234_v47, %v230_v46  ;;  %v1338_v60 = vpack.c.bf16 %v231_v51, %v227_v50  ;;  %v272_v46 = vld [vmem:[#allocation2 + $0x628] sm:$0xff]  ;;  %v270_v47 = vld [vmem:[#allocation2 + $0x618] sm:$0xff]  ;;  %v267_v51 = vld [vmem:[#allocation2 + $0x600] sm:$0xff] }
  0x51   :  { %1319 = vmatpush1.bf16.msra.mxu0 %v1318_v57  ;;  %v240_v57 = vld [vmem:[#allocation2 + $0x528] sm:$0xff]  ;;  %v269_v55 = vld [vmem:[#allocation2 + $0x610] sm:$0xff] }
  0x52   :  { %1575 = vmatpush1.bf16.msra.mxu1 %v1574_v58  ;;  %1321 = vmatprep.subr.bf16.mxu0 %v1320_v59  ;;  %v238_v58 = vld [vmem:[#allocation2 + $0x518] sm:$0xff]  ;;  %v1340_v0 = vpack.c.bf16 %v240_v57, %v236_v56  ;;  %v273_v56 = vld [vmem:[#allocation2 + $0x630] sm:$0xff]  ;;  %v276_v57 = vld [vmem:[#allocation2 + $0x648] sm:$0xff] }
  0x53   :  { %1577 = vmatprep.subr.bf16.mxu1 %v1576_v63  ;;  %v242_v59 = vld [vmem:[#allocation2 + $0x538] sm:$0xff]  ;;  %v239_v63 = vld [vmem:[#allocation2 + $0x520] sm:$0xff]  ;;  %v277_v3 = vld [vmem:[#allocation2 + $0x650] sm:$0xff] }
  0x54   :  { %v1596_v1 = vpack.c.bf16 %v242_v59, %v238_v58  ;;  %v280_v58 = vld [vmem:[#allocation2 + $0x668] sm:$0xff]  ;;  %v278_v59 = vld [vmem:[#allocation2 + $0x658] sm:$0xff]  ;;  %v285_v16 = vld [vmem:[#allocation2 + $0x690] sm:$0xff] }
  0x55   :  { %1323 = vmatpush1.bf16.msra.mxu0 %v1322_v5  ;;  %v248_v5 = vld [vmem:[#allocation2 + $0x568] sm:$0xff]  ;;  %v289_v17 = vld [vmem:[#allocation2 + $0x6b0] sm:$0xff] }
  0x56   :  { %1579 = vmatpush1.bf16.msra.mxu1 %v1578_v6  ;;  %1325 = vmatprep.subr.bf16.mxu0 %v1324_v7  ;;  %v246_v6 = vld [vmem:[#allocation2 + $0x558] sm:$0xff]  ;;  %v292_v18 = vld [vmem:[#allocation2 + $0x6c8] sm:$0xff]  ;;  %v293_v30 = vld [vmem:[#allocation2 + $0x6d0] sm:$0xff] }
  0x57   :  { %1581 = vmatprep.subr.bf16.mxu1 %v1580_v8  ;;  %v250_v7 = vld [vmem:[#allocation2 + $0x578] sm:$0xff]  ;;  %v1342_v8 = vpack.c.bf16 %v239_v63, %v235_v62  ;;  %v1614_v62 = vpack.c.bf16 %v273_v56, %v269_v55  ;;  %v275_v63 = vld [vmem:[#allocation2 + $0x640] sm:$0xff]  ;;  %v297_v31 = vld [vmem:[#allocation2 + $0x6f0] sm:$0xff] }
  0x58   :  { %v1600_v14 = vpack.c.bf16 %v250_v7, %v246_v6  ;;  %v288_v6 = vld [vmem:[#allocation2 + $0x6a8] sm:$0xff]  ;;  %v286_v7 = vld [vmem:[#allocation2 + $0x698] sm:$0xff]  ;;  %v309_v56 = vld [vmem:[#allocation2 + $0x750] sm:$0xff] }
  0x59   :  { %v300_v32 = vld [vmem:[#allocation2 + $0x708] sm:$0xff] }
  0x94   :  { %v1896_v20 = vpop.permute.xlu0 %38 }
  0x95   :  { %vm44_vm0 = vcmp.eq.s32.totalorder %v30_v13, %v1896_v20  ;;  %vm43_vm1 = vcmp.eq.s32.totalorder %v1893_v10, %v1896_v20  ;;  %vm46_vm4 = vcmp.eq.s32.totalorder %v1908_v37, %v1896_v20 }
  0x96   :  { %1228 = vmatprep.mubr.msk.f32.mxu0 %vm44_vm0, %v1855_v29  ;;  %1244 = vmatprep.mubr.msk.f32.mxu1 %vm44_vm0, %v1855_v29 }
  0x97   :  { %1229 = vmatmul.mubr.msk.f32.vlgmr.msra.gmra.mrb[0].mxu0 %vm43_vm1, %v1855_v29  ;;  %1245 = vmatmul.mubr.msk.f32.vlgmr.msra.gmra.mrb[0].mxu1 %vm43_vm1, %v1855_v29 }
  0x98   :  { %1327 = vmatpush1.bf16.msra.mxu0 %v1326_v21  ;;  %1583 = vmatpush1.bf16.msra.mxu1 %v1582_v22  ;;  %v1905_v34 = vpop.permute.xlu0 %41  ;;  %v258_v21 = vld [vmem:[#allocation2 + $0x5b8] sm:$0xff]  ;;  %v1346_v22 = vpack.c.bf16 %v247_v12, %v243_v11  ;;  %v283_v12 = vld [vmem:[#allocation2 + $0x680] sm:$0xff] }
  0x99   :  { %vm52_vm2 = vcmp.eq.s32.totalorder %v30_v13, %v1905_v34  ;;  %1329 = vmatprep.subr.bf16.mxu0 %v1328_v24  ;;  %1585 = vmatprep.subr.bf16.mxu1 %v1584_v25  ;;  %vm51_vm3 = vcmp.eq.s32.totalorder %v1893_v10, %v1905_v34  ;;  %v1344_v13 = vpack.c.bf16 %v248_v5, %v244_v4  ;;  %v251_v24 = vld [vmem:[#allocation2 + $0x580] sm:$0xff]  ;;  %v281_v4 = vld [vmem:[#allocation2 + $0x670] sm:$0xff]  ;;  %v284_v5 = vld [vmem:[#allocation2 + $0x688] sm:$0xff] }
  0x9a   :  { %1230 = vmatprep.mubr.msk.f32.mxu0 %vm52_vm2, %v1855_v29  ;;  %1246 = vmatprep.mubr.msk.f32.mxu1 %vm52_vm2, %v1855_v29  ;;  %v255_v25 = vld [vmem:[#allocation2 + $0x5a0] sm:$0xff]  ;;  %v1604_v27 = vpack.c.bf16 %v258_v21, %v254_v19  ;;  %v1618_v11 = vpack.c.bf16 %v281_v4, %v277_v3  ;;  %v296_v19 = vld [vmem:[#allocation2 + $0x6e8] sm:$0xff]  ;;  %v294_v21 = vld [vmem:[#allocation2 + $0x6d8] sm:$0xff]  ;;  %vm54_vm6 = vcmp.eq.s32.totalorder %v1908_v37, %v1905_v34 }
  0x9b   :  { %1231 = vmatmul.mubr.msk.f32.gmra.mrb[2].mxu0 %vm51_vm3, %v1855_v29  ;;  %1247 = vmatmul.mubr.msk.f32.gmra.mrb[2].mxu1 %vm51_vm3, %v1855_v29  ;;  %v317_v4 = vld [vmem:[#allocation2 + $0x790] sm:$0xff] }
  0x9c   :  { %1331 = vmatpush1.bf16.msra.mxu0 %v1330_v35  ;;  %1587 = vmatpush1.bf16.msra.mxu1 %v1586_v36  ;;  %v266_v35 = vld [vmem:[#allocation2 + $0x5f8] sm:$0xff]  ;;  %v1350_v36 = vpack.c.bf16 %v255_v25, %v251_v24  ;;  %v1622_v24 = vpack.c.bf16 %v289_v17, %v285_v16  ;;  %v291_v25 = vld [vmem:[#allocation2 + $0x6c0] sm:$0xff]  ;;  %v325_v17 = vld [vmem:[#allocation2 + $0x7d0] sm:$0xff] }
  0x9d   :  { %1232 = vmatprep.mubr.msk.f32.mxu0 %vm46_vm4, %v1855_v29  ;;  %1248 = vmatprep.mubr.msk.f32.mxu1 %vm46_vm4, %v1855_v29  ;;  %v1608_v42 = vpack.c.bf16 %v266_v35, %v262_v33  ;;  %v304_v33 = vld [vmem:[#allocation2 + $0x728] sm:$0xff]  ;;  %v302_v35 = vld [vmem:[#allocation2 + $0x718] sm:$0xff] }
  0x9e   :  { %1333 = vmatprep.subr.bf16.mxu0 %v1332_v43  ;;  %1589 = vmatprep.subr.bf16.mxu1 %v1588_v44  ;;  %v261_v43 = vld [vmem:[#allocation2 + $0x5d0] sm:$0xff] }
  0x9f   :  { %v265_v44 = vld [vmem:[#allocation2 + $0x5f0] sm:$0xff] }
  0xa0   :  { %1335 = vmatpush1.bf16.msra.mxu0 %v1334_v48  ;;  %1591 = vmatpush1.bf16.msra.mxu1 %v1590_v49  ;;  %v274_v48 = vld [vmem:[#allocation2 + $0x638] sm:$0xff]  ;;  %v1354_v49 = vpack.c.bf16 %v263_v40, %v259_v39  ;;  %v1610_v50 = vpack.c.bf16 %v265_v44, %v261_v43  ;;  %v1626_v39 = vpack.c.bf16 %v297_v31, %v293_v30  ;;  %v299_v40 = vld [vmem:[#allocation2 + $0x700] sm:$0xff]  ;;  %v301_v44 = vld [vmem:[#allocation2 + $0x710] sm:$0xff]  ;;  %v31_v31 = vadd.s32 256, %v1893_v10 }
  0xa1   :  { %1337 = vmatprep.subr.bf16.mxu0 %v1336_v52  ;;  %1593 = vmatprep.subr.bf16.mxu1 %v1592_v53  ;;  %v271_v52 = vld [vmem:[#allocation2 + $0x620] sm:$0xff]  ;;  %v1356_v53 = vpack.c.bf16 %v272_v46, %v268_v45  ;;  %v1612_v54 = vpack.c.bf16 %v274_v48, %v270_v47  ;;  %v305_v45 = vld [vmem:[#allocation2 + $0x730] sm:$0xff]  ;;  %v308_v46 = vld [vmem:[#allocation2 + $0x748] sm:$0xff] }
  0xa2   :  { %v312_v47 = vld [vmem:[#allocation2 + $0x768] sm:$0xff]  ;;  %v310_v48 = vld [vmem:[#allocation2 + $0x758] sm:$0xff]  ;;  %v335_v30 = vld [vmem:[#allocation2 + $0x820] sm:$0xff]  ;;  %vm45_vm5 = vcmp.eq.s32.totalorder %v31_v31, %v1896_v20  ;;  %vm53_vm7 = vcmp.eq.s32.totalorder %v31_v31, %v1905_v34 }
  0xa3   :  { %v375_v31 = vld [vmem:[#allocation2 + $0x960] sm:$0xff] }
  0xa4   :  { %1339 = vmatpush1.bf16.msra.mxu0 %v1338_v60  ;;  %1595 = vmatpush1.bf16.msra.mxu1 %v1594_v61  ;;  %v282_v60 = vld [vmem:[#allocation2 + $0x678] sm:$0xff]  ;;  %v1358_v61 = vpack.c.bf16 %v271_v52, %v267_v51  ;;  %v1630_v51 = vpack.c.bf16 %v305_v45, %v301_v44  ;;  %v307_v52 = vld [vmem:[#allocation2 + $0x740] sm:$0xff] }
  0xa5   :  { %1341 = vmatprep.subr.bf16.mxu0 %v1340_v0  ;;  %1597 = vmatprep.subr.bf16.mxu1 %v1596_v1  ;;  %v279_v0 = vld [vmem:[#allocation2 + $0x660] sm:$0xff]  ;;  %v1360_v1 = vpack.c.bf16 %v280_v58, %v276_v57  ;;  %v1616_v2 = vpack.c.bf16 %v282_v60, %v278_v59  ;;  %v313_v57 = vld [vmem:[#allocation2 + $0x770] sm:$0xff]  ;;  %v316_v58 = vld [vmem:[#allocation2 + $0x788] sm:$0xff] }
  0xa6   :  { %v320_v59 = vld [vmem:[#allocation2 + $0x7a8] sm:$0xff]  ;;  %v318_v60 = vld [vmem:[#allocation2 + $0x798] sm:$0xff] }
  0xa8   :  { %1343 = vmatpush1.bf16.msra.mxu0 %v1342_v8  ;;  %1599 = vmatpush1.bf16.msra.mxu1 %v1598_v9  ;;  %v290_v8 = vld [vmem:[#allocation2 + $0x6b8] sm:$0xff]  ;;  %v1362_v9 = vpack.c.bf16 %v279_v0, %v275_v63  ;;  %v1634_v63 = vpack.c.bf16 %v313_v57, %v309_v56  ;;  %v315_v0 = vld [vmem:[#allocation2 + $0x780] sm:$0xff]  ;;  %v349_v57 = vld [vmem:[#allocation2 + $0x890] sm:$0xff] }
  0xa9   :  { %1345 = vmatprep.subr.bf16.mxu0 %v1344_v13  ;;  %1601 = vmatprep.subr.bf16.mxu1 %v1600_v14  ;;  %v287_v13 = vld [vmem:[#allocation2 + $0x6a0] sm:$0xff]  ;;  %v1364_v14 = vpack.c.bf16 %v288_v6, %v284_v5  ;;  %v1620_v15 = vpack.c.bf16 %v290_v8, %v286_v7  ;;  %v321_v5 = vld [vmem:[#allocation2 + $0x7b0] sm:$0xff]  ;;  %v324_v6 = vld [vmem:[#allocation2 + $0x7c8] sm:$0xff] }
  0xaa   :  { %v328_v7 = vld [vmem:[#allocation2 + $0x7e8] sm:$0xff]  ;;  %v326_v8 = vld [vmem:[#allocation2 + $0x7d8] sm:$0xff]  ;;  %v351_v56 = vld [vmem:[#allocation2 + $0x8a0] sm:$0xff] }
  0xac   :  { %1347 = vmatpush1.bf16.msra.mxu0 %v1346_v22  ;;  %1603 = vmatpush1.bf16.msra.mxu1 %v1602_v23  ;;  %v298_v22 = vld [vmem:[#allocation2 + $0x6f8] sm:$0xff]  ;;  %v1366_v23 = vpack.c.bf16 %v287_v13, %v283_v12  ;;  %v1638_v12 = vpack.c.bf16 %v321_v5, %v317_v4  ;;  %v323_v13 = vld [vmem:[#allocation2 + $0x7c0] sm:$0xff]  ;;  %v357_v5 = vld [vmem:[#allocation2 + $0x8d0] sm:$0xff] }
  0xad   :  { %1349 = vmatprep.subr.bf16.mxu0 %v1348_v26  ;;  %1605 = vmatprep.subr.bf16.mxu1 %v1604_v27  ;;  %v295_v26 = vld [vmem:[#allocation2 + $0x6e0] sm:$0xff]  ;;  %v1368_v27 = vpack.c.bf16 %v296_v19, %v292_v18  ;;  %v1624_v28 = vpack.c.bf16 %v298_v22, %v294_v21  ;;  %v329_v18 = vld [vmem:[#allocation2 + $0x7f0] sm:$0xff]  ;;  %v332_v19 = vld [vmem:[#allocation2 + $0x808] sm:$0xff] }
  0xae   :  { %v336_v21 = vld [vmem:[#allocation2 + $0x828] sm:$0xff]  ;;  %v334_v22 = vld [vmem:[#allocation2 + $0x818] sm:$0xff]  ;;  %v359_v4 = vld [vmem:[#allocation2 + $0x8e0] sm:$0xff] }
  0xb0   :  { %1351 = vmatpush1.bf16.msra.mxu0 %v1350_v36  ;;  %1607 = vmatpush1.bf16.msra.mxu1 %v1606_v38  ;;  %v306_v36 = vld [vmem:[#allocation2 + $0x738] sm:$0xff]  ;;  %v1370_v38 = vpack.c.bf16 %v295_v26, %v291_v25  ;;  %v1642_v25 = vpack.c.bf16 %v329_v18, %v325_v17  ;;  %v1388_v26 = vpack.c.bf16 %v336_v21, %v332_v19  ;;  %v367_v17 = vld [vmem:[#allocation2 + $0x920] sm:$0xff]  ;;  %v365_v18 = vld [vmem:[#allocation2 + $0x910] sm:$0xff] }
  0xb1   :  { %1353 = vmatprep.subr.bf16.mxu0 %v1352_v41  ;;  %1609 = vmatprep.subr.bf16.mxu1 %v1608_v42  ;;  %v303_v41 = vld [vmem:[#allocation2 + $0x720] sm:$0xff]  ;;  %v1372_v42 = vpack.c.bf16 %v304_v33, %v300_v32  ;;  %v1628_v43 = vpack.c.bf16 %v306_v36, %v302_v35  ;;  %v333_v32 = vld [vmem:[#allocation2 + $0x810] sm:$0xff]  ;;  %v340_v35 = vld [vmem:[#allocation2 + $0x848] sm:$0xff] }
  0xb2   :  { %v337_v33 = vld [vmem:[#allocation2 + $0x830] sm:$0xff]  ;;  %v344_v36 = vld [vmem:[#allocation2 + $0x868] sm:$0xff] }
  0xb3   :  { %v1392_v44 = vpack.c.bf16 %v344_v36, %v340_v35  ;;  %v369_v21 = vld [vmem:[#allocation2 + $0x930] sm:$0xff]  ;;  %v380_v36 = vld [vmem:[#allocation2 + $0x988] sm:$0xff] }
  0xb4   :  { %1355 = vmatpush1.bf16.msra.mxu0 %v1354_v49  ;;  %1611 = vmatpush1.bf16.msra.mxu1 %v1610_v50  ;;  %v314_v49 = vld [vmem:[#allocation2 + $0x778] sm:$0xff]  ;;  %v1374_v50 = vpack.c.bf16 %v303_v41, %v299_v40  ;;  %v1646_v41 = vpack.c.bf16 %v337_v33, %v333_v32  ;;  %v373_v32 = vld [vmem:[#allocation2 + $0x950] sm:$0xff] }
  0xb5   :  { %1357 = vmatprep.subr.bf16.mxu0 %v1356_v53  ;;  %1613 = vmatprep.subr.bf16.mxu1 %v1612_v54  ;;  %v311_v53 = vld [vmem:[#allocation2 + $0x760] sm:$0xff]  ;;  %v1376_v54 = vpack.c.bf16 %v312_v47, %v308_v46  ;;  %v1632_v55 = vpack.c.bf16 %v314_v49, %v310_v48  ;;  %v341_v46 = vld [vmem:[#allocation2 + $0x850] sm:$0xff]  ;;  %v348_v48 = vld [vmem:[#allocation2 + $0x888] sm:$0xff]  ;;  %v1928_v49 = vadd.s32 640, %v1893_v10 }
  0xb6   :  { %v345_v47 = vld [vmem:[#allocation2 + $0x870] sm:$0xff] }
  0xb7   :  { %vm48_vm8 = vcmp.eq.s32.totalorder %v1928_v49, %v1896_v20  ;;  %v377_v35 = vld [vmem:[#allocation2 + $0x970] sm:$0xff]  ;;  %vm56_vm10 = vcmp.eq.s32.totalorder %v1928_v49, %v1905_v34 }
  0xb8   :  { %1359 = vmatpush1.bf16.msra.mxu0 %v1358_v61  ;;  %1615 = vmatpush1.bf16.msra.mxu1 %v1614_v62  ;;  %v322_v61 = vld [vmem:[#allocation2 + $0x7b8] sm:$0xff]  ;;  %v1378_v62 = vpack.c.bf16 %v311_v53, %v307_v52 }
  0xb9   :  { %1361 = vmatprep.subr.bf16.mxu0 %v1360_v1  ;;  %1617 = vmatprep.subr.bf16.mxu1 %v1616_v2  ;;  %v319_v1 = vld [vmem:[#allocation2 + $0x7a0] sm:$0xff]  ;;  %v1380_v2 = vpack.c.bf16 %v320_v59, %v316_v58  ;;  %v1636_v3 = vpack.c.bf16 %v322_v61, %v318_v60  ;;  %v354_v52 = vld [vmem:[#allocation2 + $0x8b8] sm:$0xff]  ;;  %v353_v59 = vld [vmem:[#allocation2 + $0x8b0] sm:$0xff] }
  0xba   :  { %v356_v60 = vld [vmem:[#allocation2 + $0x8c8] sm:$0xff] }
  0xbb   :  { %v360_v61 = vld [vmem:[#allocation2 + $0x8e8] sm:$0xff] }
  0xbc   :  { %1363 = vmatpush1.bf16.msra.mxu0 %v1362_v9  ;;  %1619 = vmatpush1.bf16.msra.mxu1 %v1618_v11  ;;  %v330_v9 = vld [vmem:[#allocation2 + $0x7f8] sm:$0xff]  ;;  %v1382_v11 = vpack.c.bf16 %v319_v1, %v315_v0  ;;  %v1654_v1 = vpack.c.bf16 %v353_v59, %v349_v57  ;;  %v387_v57 = vld [vmem:[#allocation2 + $0x9c0] sm:$0xff] }
  0xbd   :  { %1365 = vmatprep.subr.bf16.mxu0 %v1364_v14  ;;  %1621 = vmatprep.subr.bf16.mxu1 %v1620_v15  ;;  %v327_v14 = vld [vmem:[#allocation2 + $0x7e0] sm:$0xff]  ;;  %v1384_v15 = vpack.c.bf16 %v328_v7, %v324_v6  ;;  %v1640_v16 = vpack.c.bf16 %v330_v9, %v326_v8  ;;  %v361_v7 = vld [vmem:[#allocation2 + $0x8f0] sm:$0xff]  ;;  %v364_v8 = vld [vmem:[#allocation2 + $0x908] sm:$0xff] }
  0xbe   :  { %v368_v9 = vld [vmem:[#allocation2 + $0x928] sm:$0xff] }
  0xc0   :  { %1367 = vmatpush1.bf16.msra.mxu0 %v1366_v23  ;;  %1623 = vmatpush1.bf16.msra.mxu1 %v1622_v24  ;;  %v338_v23 = vld [vmem:[#allocation2 + $0x838] sm:$0xff]  ;;  %v1386_v24 = vpack.c.bf16 %v327_v14, %v323_v13  ;;  %v1658_v14 = vpack.c.bf16 %v361_v7, %v357_v5  ;;  %v399_v5 = vld [vmem:[#allocation2 + $0xa20] sm:$0xff] }
  0xc1   :  { %1369 = vmatprep.subr.bf16.mxu0 %v1368_v27  ;;  %1625 = vmatprep.subr.bf16.mxu1 %v1624_v28  ;;  %v1644_v27 = vpack.c.bf16 %v338_v23, %v334_v22  ;;  %v331_v28 = vld [vmem:[#allocation2 + $0x800] sm:$0xff]  ;;  %v372_v22 = vld [vmem:[#allocation2 + $0x948] sm:$0xff] }
  0xc2   :  { %v1390_v40 = vpack.c.bf16 %v335_v30, %v331_v28  ;;  %v376_v23 = vld [vmem:[#allocation2 + $0x968] sm:$0xff]  ;;  %v371_v30 = vld [vmem:[#allocation2 + $0x940] sm:$0xff] }
  0xc3   :  { %v1408_v28 = vpack.c.bf16 %v376_v23, %v372_v22  ;;  %v409_v22 = vld [vmem:[#allocation2 + $0xa70] sm:$0xff]  ;;  %v412_v23 = vld [vmem:[#allocation2 + $0xa88] sm:$0xff] }
  0xc4   :  { %1371 = vmatpush1.bf16.msra.mxu0 %v1370_v38  ;;  %1627 = vmatpush1.bf16.msra.mxu1 %v1626_v39  ;;  %v342_v38 = vld [vmem:[#allocation2 + $0x858] sm:$0xff] }
  0xc5   :  { %1373 = vmatprep.subr.bf16.mxu0 %v1372_v42  ;;  %1629 = vmatprep.subr.bf16.mxu1 %v1628_v43  ;;  %v346_v39 = vld [vmem:[#allocation2 + $0x878] sm:$0xff]  ;;  %v339_v42 = vld [vmem:[#allocation2 + $0x840] sm:$0xff] }
  0xc6   :  { %v343_v43 = vld [vmem:[#allocation2 + $0x860] sm:$0xff]  ;;  %v1648_v45 = vpack.c.bf16 %v346_v39, %v342_v38  ;;  %v384_v38 = vld [vmem:[#allocation2 + $0x9a8] sm:$0xff]  ;;  %v382_v39 = vld [vmem:[#allocation2 + $0x998] sm:$0xff] }
  0xc7   :  { %v1394_v53 = vpack.c.bf16 %v343_v43, %v339_v42  ;;  %v1666_v42 = vpack.c.bf16 %v377_v35, %v373_v32  ;;  %v1412_v43 = vpack.c.bf16 %v384_v38, %v380_v36  ;;  %v415_v32 = vld [vmem:[#allocation2 + $0xaa0] sm:$0xff]  ;;  %v417_v36 = vld [vmem:[#allocation2 + $0xab0] sm:$0xff]  ;;  %v420_v38 = vld [vmem:[#allocation2 + $0xac8] sm:$0xff] }
  0xc8   :  { %1375 = vmatpush1.bf16.msra.mxu0 %v1374_v50  ;;  %1631 = vmatpush1.bf16.msra.mxu1 %v1630_v51  ;;  %v352_v50 = vld [vmem:[#allocation2 + $0x8a8] sm:$0xff]  ;;  %v350_v51 = vld [vmem:[#allocation2 + $0x898] sm:$0xff] }
  0xc9   :  { %1377 = vmatprep.subr.bf16.mxu0 %v1376_v54  ;;  %1633 = vmatprep.subr.bf16.mxu1 %v1632_v55  ;;  %v1650_v54 = vpack.c.bf16 %v345_v47, %v341_v46  ;;  %v347_v55 = vld [vmem:[#allocation2 + $0x880] sm:$0xff]  ;;  %v1396_v37 = vpack.c.bf16 %v352_v50, %v348_v48  ;;  %v1652_v58 = vpack.c.bf16 %v354_v52, %v350_v51  ;;  %v381_v46 = vld [vmem:[#allocation2 + $0x990] sm:$0xff]  ;;  %v388_v50 = vld [vmem:[#allocation2 + $0x9c8] sm:$0xff] }
  0xca   :  { %v1398_v0 = vpack.c.bf16 %v351_v56, %v347_v55  ;;  %v385_v48 = vld [vmem:[#allocation2 + $0x9b0] sm:$0xff]  ;;  %v392_v51 = vld [vmem:[#allocation2 + $0x9e8] sm:$0xff]  ;;  %v390_v52 = vld [vmem:[#allocation2 + $0x9d8] sm:$0xff] }
  0xcb   :  { %v1670_v55 = vpack.c.bf16 %v385_v48, %v381_v46  ;;  %v1416_v56 = vpack.c.bf16 %v392_v51, %v388_v50  ;;  %v423_v46 = vld [vmem:[#allocation2 + $0xae0] sm:$0xff]  ;;  %v425_v50 = vld [vmem:[#allocation2 + $0xaf0] sm:$0xff]  ;;  %v428_v51 = vld [vmem:[#allocation2 + $0xb08] sm:$0xff] }
  0xcc   :  { %1379 = vmatpush1.bf16.msra.mxu0 %v1378_v62  ;;  %1635 = vmatpush1.bf16.msra.mxu1 %v1634_v63  ;;  %v358_v62 = vld [vmem:[#allocation2 + $0x8d8] sm:$0xff] }
  0xcd   :  { %1381 = vmatprep.subr.bf16.mxu0 %v1380_v2  ;;  %1637 = vmatprep.subr.bf16.mxu1 %v1636_v3  ;;  %v362_v63 = vld [vmem:[#allocation2 + $0x8f8] sm:$0xff]  ;;  %v1400_v2 = vpack.c.bf16 %v360_v61, %v356_v60  ;;  %v355_v3 = vld [vmem:[#allocation2 + $0x8c0] sm:$0xff]  ;;  %v393_v60 = vld [vmem:[#allocation2 + $0x9f0] sm:$0xff] }
  0xce   :  { %v1656_v6 = vpack.c.bf16 %v362_v63, %v358_v62  ;;  %v1402_v13 = vpack.c.bf16 %v359_v4, %v355_v3  ;;  %v396_v61 = vld [vmem:[#allocation2 + $0xa08] sm:$0xff]  ;;  %v398_v63 = vld [vmem:[#allocation2 + $0xa18] sm:$0xff]  ;;  %v395_v4 = vld [vmem:[#allocation2 + $0xa00] sm:$0xff] }
  0xcf   :  { %v400_v62 = vld [vmem:[#allocation2 + $0xa28] sm:$0xff] }
  0xd0   :  { %1383 = vmatpush1.bf16.msra.mxu0 %v1382_v11  ;;  %1639 = vmatpush1.bf16.msra.mxu1 %v1638_v12  ;;  %v366_v11 = vld [vmem:[#allocation2 + $0x918] sm:$0xff]  ;;  %v1420_v3 = vpack.c.bf16 %v400_v62, %v396_v61  ;;  %v433_v61 = vld [vmem:[#allocation2 + $0xb30] sm:$0xff]  ;;  %v436_v62 = vld [vmem:[#allocation2 + $0xb48] sm:$0xff] }
  0xd1   :  { %1385 = vmatprep.subr.bf16.mxu0 %v1384_v15  ;;  %1641 = vmatprep.subr.bf16.mxu1 %v1640_v16  ;;  %v370_v12 = vld [vmem:[#allocation2 + $0x938] sm:$0xff]  ;;  %v1404_v15 = vpack.c.bf16 %v368_v9, %v364_v8  ;;  %v363_v16 = vld [vmem:[#allocation2 + $0x900] sm:$0xff]  ;;  %v401_v8 = vld [vmem:[#allocation2 + $0xa30] sm:$0xff] }
  0xd2   :  { %v1660_v19 = vpack.c.bf16 %v370_v12, %v366_v11  ;;  %v404_v9 = vld [vmem:[#allocation2 + $0xa48] sm:$0xff]  ;;  %v406_v12 = vld [vmem:[#allocation2 + $0xa58] sm:$0xff] }
  0xd3   :  { %v408_v11 = vld [vmem:[#allocation2 + $0xa68] sm:$0xff] }
  0xd4   :  { %1387 = vmatpush1.bf16.msra.mxu0 %v1386_v24  ;;  %1643 = vmatpush1.bf16.msra.mxu1 %v1642_v25  ;;  %v374_v24 = vld [vmem:[#allocation2 + $0x958] sm:$0xff] }
  0xd5   :  { %1389 = vmatprep.subr.bf16.mxu0 %v1388_v26  ;;  %1645 = vmatprep.subr.bf16.mxu1 %v1644_v27  ;;  %v378_v25 = vld [vmem:[#allocation2 + $0x978] sm:$0xff]  ;;  %v1406_v26 = vpack.c.bf16 %v367_v17, %v363_v16  ;;  %v1662_v27 = vpack.c.bf16 %v369_v21, %v365_v18  ;;  %v1424_v16 = vpack.c.bf16 %v408_v11, %v404_v9  ;;  %v403_v17 = vld [vmem:[#allocation2 + $0xa40] sm:$0xff]  ;;  %v441_v9 = vld [vmem:[#allocation2 + $0xb70] sm:$0xff] }
  0xd6   :  { %v1664_v33 = vpack.c.bf16 %v378_v25, %v374_v24  ;;  %v407_v18 = vld [vmem:[#allocation2 + $0xa60] sm:$0xff]  ;;  %v416_v24 = vld [vmem:[#allocation2 + $0xaa8] sm:$0xff]  ;;  %v414_v25 = vld [vmem:[#allocation2 + $0xa98] sm:$0xff] }
  0xd7   :  { %1233 = vmatmul.mubr.msk.f32.vlgmr.msra.gmra.mrb[0].mxu0 %vm45_vm5, %v1855_v29  ;;  %1249 = vmatmul.mubr.msk.f32.vlgmr.msra.gmra.mrb[0].mxu1 %vm45_vm5, %v1855_v29  ;;  %v444_v11 = vld [vmem:[#allocation2 + $0xb88] sm:$0xff] }
  0xd8   :  { %1234 = vmatprep.mubr.msk.f32.mxu0 %vm54_vm6, %v1855_v29  ;;  %1391 = vmatpush1.bf16.msra.mxu0 %v1390_v40  ;;  %v386_v40 = vld [vmem:[#allocation2 + $0x9b8] sm:$0xff] }
  0xd9   :  { %1250 = vmatprep.mubr.msk.f32.mxu1 %vm54_vm6, %v1855_v29  ;;  %1647 = vmatpush1.bf16.msra.mxu1 %v1646_v41  ;;  %v1410_v41 = vpack.c.bf16 %v375_v31, %v371_v30  ;;  %v1668_v47 = vpack.c.bf16 %v386_v40, %v382_v39  ;;  %v1428_v30 = vpack.c.bf16 %v416_v24, %v412_v23  ;;  %v411_v31 = vld [vmem:[#allocation2 + $0xa80] sm:$0xff]  ;;  %v424_v39 = vld [vmem:[#allocation2 + $0xae8] sm:$0xff]  ;;  %v422_v40 = vld [vmem:[#allocation2 + $0xad8] sm:$0xff] }
  0xda   :  { %1393 = vmatprep.subr.bf16.mxu0 %v1392_v44  ;;  %1649 = vmatprep.subr.bf16.mxu1 %v1648_v45  ;;  %v379_v44 = vld [vmem:[#allocation2 + $0x980] sm:$0xff]  ;;  %v449_v23 = vld [vmem:[#allocation2 + $0xbb0] sm:$0xff]  ;;  %v452_v24 = vld [vmem:[#allocation2 + $0xbc8] sm:$0xff] }
  0xdb   :  { %1235 = vmatmul.mubr.msk.f32.gmra.mrb[2].mxu0 %vm53_vm7, %v1855_v29  ;;  %1251 = vmatmul.mubr.msk.f32.gmra.mrb[2].mxu1 %vm53_vm7, %v1855_v29  ;;  %v383_v45 = vld [vmem:[#allocation2 + $0x9a0] sm:$0xff] }
  0xdc   :  { %1395 = vmatpush1.bf16.msra.mxu0 %v1394_v53  ;;  %1236 = vmatprep.mubr.msk.f32.mxu0 %vm48_vm8, %v1855_v29  ;;  %v394_v53 = vld [vmem:[#allocation2 + $0x9f8] sm:$0xff] }
  0xdd   :  { %1651 = vmatpush1.bf16.msra.mxu1 %v1650_v54  ;;  %1252 = vmatprep.mubr.msk.f32.mxu1 %vm48_vm8, %v1855_v29  ;;  %v1414_v54 = vpack.c.bf16 %v383_v45, %v379_v44  ;;  %v1672_v59 = vpack.c.bf16 %v394_v53, %v390_v52  ;;  %v1432_v44 = vpack.c.bf16 %v424_v39, %v420_v38  ;;  %v419_v45 = vld [vmem:[#allocation2 + $0xac0] sm:$0xff]  ;;  %v432_v52 = vld [vmem:[#allocation2 + $0xb28] sm:$0xff]  ;;  %v430_v53 = vld [vmem:[#allocation2 + $0xb18] sm:$0xff] }
  0xde   :  { %1397 = vmatprep.subr.bf16.mxu0 %v1396_v37  ;;  %1653 = vmatprep.subr.bf16.mxu1 %v1652_v58  ;;  %v391_v37 = vld [vmem:[#allocation2 + $0x9e0] sm:$0xff]  ;;  %v389_v58 = vld [vmem:[#allocation2 + $0x9d0] sm:$0xff]  ;;  %v460_v39 = vld [vmem:[#allocation2 + $0xc08] sm:$0xff] }
  0xdf   :  { %v457_v38 = vld [vmem:[#allocation2 + $0xbf0] sm:$0xff] }
  0xe0   :  { %1399 = vmatpush1.bf16.msra.mxu0 %v1398_v0  ;;  %v402_v0 = vld [vmem:[#allocation2 + $0xa38] sm:$0xff] }
  0xe1   :  { %1655 = vmatpush1.bf16.msra.mxu1 %v1654_v1  ;;  %1401 = vmatprep.subr.bf16.mxu0 %v1400_v2  ;;  %v1418_v1 = vpack.c.bf16 %v391_v37, %v387_v57  ;;  %v1674_v2 = vpack.c.bf16 %v393_v60, %v389_v58  ;;  %v1676_v7 = vpack.c.bf16 %v402_v0, %v398_v63  ;;  %v427_v37 = vld [vmem:[#allocation2 + $0xb00] sm:$0xff]  ;;  %v440_v63 = vld [vmem:[#allocation2 + $0xb68] sm:$0xff]  ;;  %v438_v0 = vld [vmem:[#allocation2 + $0xb58] sm:$0xff] }
  0xe2   :  { %1657 = vmatprep.subr.bf16.mxu1 %v1656_v6  ;;  %v397_v6 = vld [vmem:[#allocation2 + $0xa10] sm:$0xff]  ;;  %v1436_v57 = vpack.c.bf16 %v432_v52, %v428_v51  ;;  %v431_v58 = vld [vmem:[#allocation2 + $0xb20] sm:$0xff] }
  0xe3   :  { %v461_v51 = vld [vmem:[#allocation2 + $0xc10] sm:$0xff] }
  0xe4   :  { %1403 = vmatpush1.bf16.msra.mxu0 %v1402_v13  ;;  %v410_v13 = vld [vmem:[#allocation2 + $0xa78] sm:$0xff]  ;;  %v465_v52 = vld [vmem:[#allocation2 + $0xc30] sm:$0xff] }
  0xe5   :  { %1659 = vmatpush1.bf16.msra.mxu1 %v1658_v14  ;;  %1405 = vmatprep.subr.bf16.mxu0 %v1404_v15  ;;  %v1422_v14 = vpack.c.bf16 %v399_v5, %v395_v4  ;;  %v1678_v15 = vpack.c.bf16 %v401_v8, %v397_v6  ;;  %v1680_v21 = vpack.c.bf16 %v410_v13, %v406_v12  ;;  %v435_v5 = vld [vmem:[#allocation2 + $0xb40] sm:$0xff]  ;;  %v448_v12 = vld [vmem:[#allocation2 + $0xba8] sm:$0xff]  ;;  %v446_v13 = vld [vmem:[#allocation2 + $0xb98] sm:$0xff] }
  0xe6   :  { %1661 = vmatprep.subr.bf16.mxu1 %v1660_v19  ;;  %v405_v19 = vld [vmem:[#allocation2 + $0xa50] sm:$0xff]  ;;  %v1440_v4 = vpack.c.bf16 %v440_v63, %v436_v62  ;;  %v439_v6 = vld [vmem:[#allocation2 + $0xb60] sm:$0xff]  ;;  %v1945_v63 = vadd.s32 896, %v1893_v10 }
  0xe8   :  { %1407 = vmatpush1.bf16.msra.mxu0 %v1406_v26  ;;  %v418_v26 = vld [vmem:[#allocation2 + $0xab8] sm:$0xff]  ;;  %vm50_vm12 = vcmp.eq.s32.totalorder %v1945_v63, %v1896_v20  ;;  %vm58_vm14 = vcmp.eq.s32.totalorder %v1945_v63, %v1905_v34 }
  0xe9   :  { %1663 = vmatpush1.bf16.msra.mxu1 %v1662_v27  ;;  %1409 = vmatprep.subr.bf16.mxu0 %v1408_v28  ;;  %v1426_v27 = vpack.c.bf16 %v407_v18, %v403_v17  ;;  %v1682_v28 = vpack.c.bf16 %v409_v22, %v405_v19  ;;  %v1684_v35 = vpack.c.bf16 %v418_v26, %v414_v25  ;;  %v443_v18 = vld [vmem:[#allocation2 + $0xb80] sm:$0xff]  ;;  %v456_v25 = vld [vmem:[#allocation2 + $0xbe8] sm:$0xff]  ;;  %v454_v26 = vld [vmem:[#allocation2 + $0xbd8] sm:$0xff] }
  0xea   :  { %1665 = vmatprep.subr.bf16.mxu1 %v1664_v33  ;;  %v413_v33 = vld [vmem:[#allocation2 + $0xa90] sm:$0xff]  ;;  %v1444_v17 = vpack.c.bf16 %v448_v12, %v444_v11  ;;  %v447_v19 = vld [vmem:[#allocation2 + $0xba0] sm:$0xff] }
  0xeb   :  { %v481_v12 = vld [vmem:[#allocation2 + $0xcb0] sm:$0xff] }
  0xec   :  { %1411 = vmatpush1.bf16.msra.mxu0 %v1410_v41  ;;  %v426_v41 = vld [vmem:[#allocation2 + $0xaf8] sm:$0xff] }
  0xed   :  { %1667 = vmatpush1.bf16.msra.mxu1 %v1666_v42  ;;  %1413 = vmatprep.subr.bf16.mxu0 %v1412_v43  ;;  %v1430_v42 = vpack.c.bf16 %v415_v32, %v411_v31  ;;  %v1686_v43 = vpack.c.bf16 %v417_v36, %v413_v33  ;;  %v1688_v48 = vpack.c.bf16 %v426_v41, %v422_v40  ;;  %v451_v32 = vld [vmem:[#allocation2 + $0xbc0] sm:$0xff]  ;;  %v464_v40 = vld [vmem:[#allocation2 + $0xc28] sm:$0xff]  ;;  %v462_v41 = vld [vmem:[#allocation2 + $0xc18] sm:$0xff] }
  0xee   :  { %1669 = vmatprep.subr.bf16.mxu1 %v1668_v47  ;;  %v421_v47 = vld [vmem:[#allocation2 + $0xad0] sm:$0xff]  ;;  %v1448_v31 = vpack.c.bf16 %v456_v25, %v452_v24  ;;  %v455_v33 = vld [vmem:[#allocation2 + $0xbe0] sm:$0xff] }
  0xef   :  { %v489_v25 = vld [vmem:[#allocation2 + $0xcf0] sm:$0xff] }
  0xf0   :  { %1415 = vmatpush1.bf16.msra.mxu0 %v1414_v54  ;;  %v434_v54 = vld [vmem:[#allocation2 + $0xb38] sm:$0xff] }
  0xf1   :  { %1671 = vmatpush1.bf16.msra.mxu1 %v1670_v55  ;;  %1417 = vmatprep.subr.bf16.mxu0 %v1416_v56  ;;  %v1434_v55 = vpack.c.bf16 %v423_v46, %v419_v45  ;;  %v1690_v56 = vpack.c.bf16 %v425_v50, %v421_v47  ;;  %v1692_v60 = vpack.c.bf16 %v434_v54, %v430_v53  ;;  %v33_v46 = vadd.s32 512, %v1893_v10  ;;  %v463_v50 = vld [vmem:[#allocation2 + $0xc20] sm:$0xff]  ;;  %v468_v53 = vld [vmem:[#allocation2 + $0xc48] sm:$0xff] }
  0xf2   :  { %1673 = vmatprep.subr.bf16.mxu1 %v1672_v59  ;;  %v429_v59 = vld [vmem:[#allocation2 + $0xb10] sm:$0xff]  ;;  %v1452_v45 = vpack.c.bf16 %v464_v40, %v460_v39  ;;  %v472_v54 = vld [vmem:[#allocation2 + $0xc68] sm:$0xff] }
  0xf3   :  { %vm47_vm9 = vcmp.eq.s32.totalorder %v33_v46, %v1896_v20  ;;  %vm55_vm11 = vcmp.eq.s32.totalorder %v33_v46, %v1905_v34  ;;  %v497_v40 = vld [vmem:[#allocation2 + $0xd30] sm:$0xff] }
  0xf4   :  { %1419 = vmatpush1.bf16.msra.mxu0 %v1418_v1  ;;  %v442_v1 = vld [vmem:[#allocation2 + $0xb78] sm:$0xff] }
  0xf5   :  { %1675 = vmatpush1.bf16.msra.mxu1 %v1674_v2  ;;  %1421 = vmatprep.subr.bf16.mxu0 %v1420_v3  ;;  %v1438_v2 = vpack.c.bf16 %v431_v58, %v427_v37  ;;  %v1694_v3 = vpack.c.bf16 %v433_v61, %v429_v59  ;;  %v1696_v8 = vpack.c.bf16 %v442_v1, %v438_v0  ;;  %v467_v59 = vld [vmem:[#allocation2 + $0xc40] sm:$0xff]  ;;  %v469_v61 = vld [vmem:[#allocation2 + $0xc50] sm:$0xff]  ;;  %v476_v1 = vld [vmem:[#allocation2 + $0xc88] sm:$0xff] }
  0xf6   :  { %1677 = vmatprep.subr.bf16.mxu1 %v1676_v7  ;;  %v437_v7 = vld [vmem:[#allocation2 + $0xb50] sm:$0xff]  ;;  %v1710_v37 = vpack.c.bf16 %v465_v52, %v461_v51  ;;  %v1456_v58 = vpack.c.bf16 %v472_v54, %v468_v53  ;;  %v508_v54 = vld [vmem:[#allocation2 + $0xd88] sm:$0xff] }
  0xf7   :  { %v473_v0 = vld [vmem:[#allocation2 + $0xc70] sm:$0xff] }
  0xf8   :  { %1423 = vmatpush1.bf16.msra.mxu0 %v1422_v14  ;;  %v450_v14 = vld [vmem:[#allocation2 + $0xbb8] sm:$0xff]  ;;  %v1714_v49 = vpack.c.bf16 %v473_v0, %v469_v61  ;;  %v501_v51 = vld [vmem:[#allocation2 + $0xd50] sm:$0xff]  ;;  %v511_v61 = vld [vmem:[#allocation2 + $0xda0] sm:$0xff] }
  0xf9   :  { %1679 = vmatpush1.bf16.msra.mxu1 %v1678_v15  ;;  %1425 = vmatprep.subr.bf16.mxu0 %v1424_v16  ;;  %v1442_v15 = vpack.c.bf16 %v439_v6, %v435_v5  ;;  %v1698_v16 = vpack.c.bf16 %v441_v9, %v437_v7  ;;  %v1700_v22 = vpack.c.bf16 %v450_v14, %v446_v13  ;;  %v475_v7 = vld [vmem:[#allocation2 + $0xc80] sm:$0xff]  ;;  %v477_v9 = vld [vmem:[#allocation2 + $0xc90] sm:$0xff]  ;;  %v484_v13 = vld [vmem:[#allocation2 + $0xcc8] sm:$0xff] }
  0xfa   :  { %1681 = vmatprep.subr.bf16.mxu1 %v1680_v21  ;;  %v445_v21 = vld [vmem:[#allocation2 + $0xb90] sm:$0xff]  ;;  %v488_v14 = vld [vmem:[#allocation2 + $0xce8] sm:$0xff] }
  0xfb   :  { %v505_v53 = vld [vmem:[#allocation2 + $0xd70] sm:$0xff] }
  0xfc   :  { %1427 = vmatpush1.bf16.msra.mxu0 %v1426_v27  ;;  %v458_v27 = vld [vmem:[#allocation2 + $0xbf8] sm:$0xff] }
  0xfd   :  { %1683 = vmatpush1.bf16.msra.mxu1 %v1682_v28  ;;  %1429 = vmatprep.subr.bf16.mxu0 %v1428_v30  ;;  %v1446_v28 = vpack.c.bf16 %v447_v19, %v443_v18  ;;  %v1702_v30 = vpack.c.bf16 %v449_v23, %v445_v21  ;;  %v1704_v36 = vpack.c.bf16 %v458_v27, %v454_v26  ;;  %v483_v21 = vld [vmem:[#allocation2 + $0xcc0] sm:$0xff]  ;;  %v485_v23 = vld [vmem:[#allocation2 + $0xcd0] sm:$0xff]  ;;  %v492_v26 = vld [vmem:[#allocation2 + $0xd08] sm:$0xff] }
  0xfe   :  { %1685 = vmatprep.subr.bf16.mxu1 %v1684_v35  ;;  %v453_v35 = vld [vmem:[#allocation2 + $0xbd0] sm:$0xff]  ;;  %v1718_v18 = vpack.c.bf16 %v481_v12, %v477_v9  ;;  %v1464_v19 = vpack.c.bf16 %v488_v14, %v484_v13  ;;  %v496_v27 = vld [vmem:[#allocation2 + $0xd28] sm:$0xff]  ;;  %v519_v9 = vld [vmem:[#allocation2 + $0xde0] sm:$0xff] }
  0xff   :  { %v521_v13 = vld [vmem:[#allocation2 + $0xdf0] sm:$0xff]  ;;  %v524_v14 = vld [vmem:[#allocation2 + $0xe08] sm:$0xff] }
 0x100   :  { %1431 = vmatpush1.bf16.msra.mxu0 %v1430_v42  ;;  %v466_v42 = vld [vmem:[#allocation2 + $0xc38] sm:$0xff] }
 0x101   :  { %1687 = vmatpush1.bf16.msra.mxu1 %v1686_v43  ;;  %1433 = vmatprep.subr.bf16.mxu0 %v1432_v44  ;;  %v1450_v43 = vpack.c.bf16 %v455_v33, %v451_v32  ;;  %v1706_v44 = vpack.c.bf16 %v457_v38, %v453_v35  ;;  %v1708_v47 = vpack.c.bf16 %v466_v42, %v462_v41  ;;  %v491_v35 = vld [vmem:[#allocation2 + $0xd00] sm:$0xff]  ;;  %v493_v38 = vld [vmem:[#allocation2 + $0xd10] sm:$0xff]  ;;  %v500_v41 = vld [vmem:[#allocation2 + $0xd48] sm:$0xff] }
 0x102   :  { %1689 = vmatprep.subr.bf16.mxu1 %v1688_v48  ;;  %v459_v48 = vld [vmem:[#allocation2 + $0xc00] sm:$0xff]  ;;  %v1722_v32 = vpack.c.bf16 %v489_v25, %v485_v23  ;;  %v1468_v33 = vpack.c.bf16 %v496_v27, %v492_v26  ;;  %v504_v42 = vld [vmem:[#allocation2 + $0xd68] sm:$0xff]  ;;  %v1726_v46 = vpack.c.bf16 %v497_v40, %v493_v38  ;;  %v529_v26 = vld [vmem:[#allocation2 + $0xe30] sm:$0xff] }
 0x103   :  { %v527_v23 = vld [vmem:[#allocation2 + $0xe20] sm:$0xff]  ;;  %v532_v27 = vld [vmem:[#allocation2 + $0xe48] sm:$0xff] }
 0x104   :  { %1435 = vmatpush1.bf16.msra.mxu0 %v1434_v55  ;;  %v470_v55 = vld [vmem:[#allocation2 + $0xc58] sm:$0xff]  ;;  %v535_v38 = vld [vmem:[#allocation2 + $0xe60] sm:$0xff] }
 0x105   :  { %1691 = vmatpush1.bf16.msra.mxu1 %v1690_v56  ;;  %1437 = vmatprep.subr.bf16.mxu0 %v1436_v57  ;;  %v474_v56 = vld [vmem:[#allocation2 + $0xc78] sm:$0xff]  ;;  %v1454_v57 = vpack.c.bf16 %v463_v50, %v459_v48  ;;  %v499_v48 = vld [vmem:[#allocation2 + $0xd40] sm:$0xff] }
 0x106   :  { %1693 = vmatprep.subr.bf16.mxu1 %v1692_v60  ;;  %v471_v60 = vld [vmem:[#allocation2 + $0xc60] sm:$0xff]  ;;  %v1712_v62 = vpack.c.bf16 %v474_v56, %v470_v55  ;;  %v512_v55 = vld [vmem:[#allocation2 + $0xda8] sm:$0xff]  ;;  %v510_v56 = vld [vmem:[#allocation2 + $0xd98] sm:$0xff] }
 0x107   :  { %v1458_v5 = vpack.c.bf16 %v471_v60, %v467_v59  ;;  %v503_v50 = vld [vmem:[#allocation2 + $0xd60] sm:$0xff]  ;;  %v1476_v59 = vpack.c.bf16 %v512_v55, %v508_v54  ;;  %v545_v54 = vld [vmem:[#allocation2 + $0xeb0] sm:$0xff]  ;;  %v548_v55 = vld [vmem:[#allocation2 + $0xec8] sm:$0xff] }
 0x108   :  { %1439 = vmatpush1.bf16.msra.mxu0 %v1438_v2  ;;  %v480_v2 = vld [vmem:[#allocation2 + $0xca8] sm:$0xff]  ;;  %v507_v60 = vld [vmem:[#allocation2 + $0xd80] sm:$0xff] }
 0x109   :  { %1695 = vmatpush1.bf16.msra.mxu1 %v1694_v3  ;;  %1441 = vmatprep.subr.bf16.mxu0 %v1440_v4  ;;  %v478_v3 = vld [vmem:[#allocation2 + $0xc98] sm:$0xff]  ;;  %v1460_v6 = vpack.c.bf16 %v480_v2, %v476_v1  ;;  %v513_v1 = vld [vmem:[#allocation2 + $0xdb0] sm:$0xff]  ;;  %v516_v2 = vld [vmem:[#allocation2 + $0xdc8] sm:$0xff] }
 0x10a   :  { %1697 = vmatprep.subr.bf16.mxu1 %v1696_v8  ;;  %v482_v4 = vld [vmem:[#allocation2 + $0xcb8] sm:$0xff]  ;;  %v479_v8 = vld [vmem:[#allocation2 + $0xca0] sm:$0xff] }
 0x10b   :  { %v1716_v11 = vpack.c.bf16 %v482_v4, %v478_v3  ;;  %v520_v3 = vld [vmem:[#allocation2 + $0xde8] sm:$0xff]  ;;  %v518_v4 = vld [vmem:[#allocation2 + $0xdd8] sm:$0xff] }
 0x10c   :  { %1443 = vmatpush1.bf16.msra.mxu0 %v1442_v15  ;;  %v486_v15 = vld [vmem:[#allocation2 + $0xcd8] sm:$0xff] }
 0x10d   :  { %1699 = vmatpush1.bf16.msra.mxu1 %v1698_v16  ;;  %1445 = vmatprep.subr.bf16.mxu0 %v1444_v17  ;;  %v490_v16 = vld [vmem:[#allocation2 + $0xcf8] sm:$0xff]  ;;  %v1462_v17 = vpack.c.bf16 %v479_v8, %v475_v7  ;;  %v1480_v7 = vpack.c.bf16 %v520_v3, %v516_v2  ;;  %v515_v8 = vld [vmem:[#allocation2 + $0xdc0] sm:$0xff]  ;;  %v553_v2 = vld [vmem:[#allocation2 + $0xef0] sm:$0xff] }
 0x10e   :  { %1701 = vmatprep.subr.bf16.mxu1 %v1700_v22  ;;  %v487_v22 = vld [vmem:[#allocation2 + $0xce0] sm:$0xff]  ;;  %v1720_v24 = vpack.c.bf16 %v490_v16, %v486_v15  ;;  %v528_v15 = vld [vmem:[#allocation2 + $0xe28] sm:$0xff]  ;;  %v526_v16 = vld [vmem:[#allocation2 + $0xe18] sm:$0xff] }
 0x10f   :  { %v556_v3 = vld [vmem:[#allocation2 + $0xf08] sm:$0xff] }
 0x110   :  { %1447 = vmatpush1.bf16.msra.mxu0 %v1446_v28  ;;  %v494_v28 = vld [vmem:[#allocation2 + $0xd18] sm:$0xff] }
 0x111   :  { %1703 = vmatpush1.bf16.msra.mxu1 %v1702_v30  ;;  %1449 = vmatprep.subr.bf16.mxu0 %v1448_v31  ;;  %v498_v30 = vld [vmem:[#allocation2 + $0xd38] sm:$0xff]  ;;  %v1466_v31 = vpack.c.bf16 %v487_v22, %v483_v21  ;;  %v1484_v21 = vpack.c.bf16 %v528_v15, %v524_v14  ;;  %v523_v22 = vld [vmem:[#allocation2 + $0xe00] sm:$0xff]  ;;  %v561_v14 = vld [vmem:[#allocation2 + $0xf30] sm:$0xff] }
 0x112   :  { %1705 = vmatprep.subr.bf16.mxu1 %v1704_v36  ;;  %v495_v36 = vld [vmem:[#allocation2 + $0xd20] sm:$0xff]  ;;  %v1724_v39 = vpack.c.bf16 %v498_v30, %v494_v28  ;;  %v536_v28 = vld [vmem:[#allocation2 + $0xe68] sm:$0xff]  ;;  %v534_v30 = vld [vmem:[#allocation2 + $0xe58] sm:$0xff] }
 0x113   :  { %v564_v15 = vld [vmem:[#allocation2 + $0xf48] sm:$0xff] }
 0x114   :  { %1451 = vmatpush1.bf16.msra.mxu0 %v1450_v43  ;;  %v502_v43 = vld [vmem:[#allocation2 + $0xd58] sm:$0xff] }
 0x115   :  { %1707 = vmatpush1.bf16.msra.mxu1 %v1706_v44  ;;  %1453 = vmatprep.subr.bf16.mxu0 %v1452_v45  ;;  %v506_v44 = vld [vmem:[#allocation2 + $0xd78] sm:$0xff]  ;;  %v1470_v45 = vpack.c.bf16 %v495_v36, %v491_v35  ;;  %v1488_v35 = vpack.c.bf16 %v536_v28, %v532_v27  ;;  %v531_v36 = vld [vmem:[#allocation2 + $0xe40] sm:$0xff]  ;;  %v569_v27 = vld [vmem:[#allocation2 + $0xf70] sm:$0xff] }
 0x116   :  { %1709 = vmatprep.subr.bf16.mxu1 %v1708_v47  ;;  %v1472_v47 = vpack.c.bf16 %v504_v42, %v500_v41  ;;  %v1728_v52 = vpack.c.bf16 %v506_v44, %v502_v43  ;;  %v537_v41 = vld [vmem:[#allocation2 + $0xe70] sm:$0xff]  ;;  %v540_v42 = vld [vmem:[#allocation2 + $0xe88] sm:$0xff]  ;;  %v542_v44 = vld [vmem:[#allocation2 + $0xe98] sm:$0xff] }
 0x117   :  { %1237 = vmatmul.mubr.msk.f32.vlgmr.msra.gmra.mrb[0].mxu0 %vm47_vm9, %v1855_v29  ;;  %v544_v43 = vld [vmem:[#allocation2 + $0xea8] sm:$0xff] }
 0x118   :  { %1253 = vmatmul.mubr.msk.f32.vlgmr.msra.gmra.mrb[0].mxu1 %vm47_vm9, %v1855_v29  ;;  %1238 = vmatprep.mubr.msk.f32.mxu0 %vm56_vm10, %v1855_v29  ;;  %v572_v28 = vld [vmem:[#allocation2 + $0xf88] sm:$0xff] }
 0x119   :  { %1455 = vmatpush1.bf16.msra.mxu0 %v1454_v57  ;;  %1254 = vmatprep.mubr.msk.f32.mxu1 %vm56_vm10, %v1855_v29  ;;  %v514_v57 = vld [vmem:[#allocation2 + $0xdb8] sm:$0xff] }
 0x11a   :  { %1711 = vmatpush1.bf16.msra.mxu1 %v1710_v37  ;;  %1457 = vmatprep.subr.bf16.mxu0 %v1456_v58  ;;  %v1474_v37 = vpack.c.bf16 %v503_v50, %v499_v48  ;;  %v1730_v58 = vpack.c.bf16 %v505_v53, %v501_v51  ;;  %v1732_v0 = vpack.c.bf16 %v514_v57, %v510_v56  ;;  %v539_v50 = vld [vmem:[#allocation2 + $0xe80] sm:$0xff]  ;;  %v552_v56 = vld [vmem:[#allocation2 + $0xee8] sm:$0xff]  ;;  %v550_v57 = vld [vmem:[#allocation2 + $0xed8] sm:$0xff] }
 0x11b   :  { %1239 = vmatmul.mubr.msk.f32.gmra.mrb[2].mxu0 %vm55_vm11, %v1855_v29  ;;  %1713 = vmatprep.subr.bf16.mxu1 %v1712_v62  ;;  %v509_v62 = vld [vmem:[#allocation2 + $0xd90] sm:$0xff]  ;;  %v1492_v48 = vpack.c.bf16 %v544_v43, %v540_v42  ;;  %v543_v51 = vld [vmem:[#allocation2 + $0xea0] sm:$0xff]  ;;  %v580_v43 = vld [vmem:[#allocation2 + $0xfc8] sm:$0xff] }
 0x11c   :  { %1255 = vmatmul.mubr.msk.f32.gmra.mrb[2].mxu1 %vm55_vm11, %v1855_v29  ;;  %1240 = vmatprep.mubr.msk.f32.mxu0 %vm50_vm12, %v1855_v29  ;;  %v577_v42 = vld [vmem:[#allocation2 + $0xfb0] sm:$0xff] }
 0x11d   :  { %1459 = vmatpush1.bf16.msra.mxu0 %v1458_v5  ;;  %1256 = vmatprep.mubr.msk.f32.mxu1 %vm50_vm12, %v1855_v29  ;;  %v522_v5 = vld [vmem:[#allocation2 + $0xdf8] sm:$0xff] }
 0x11e   :  { %1715 = vmatpush1.bf16.msra.mxu1 %v1714_v49  ;;  %1461 = vmatprep.subr.bf16.mxu0 %v1460_v6  ;;  %v1478_v49 = vpack.c.bf16 %v511_v61, %v507_v60  ;;  %v1734_v6 = vpack.c.bf16 %v513_v1, %v509_v62  ;;  %v1736_v12 = vpack.c.bf16 %v522_v5, %v518_v4  ;;  %v547_v61 = vld [vmem:[#allocation2 + $0xec0] sm:$0xff]  ;;  %v560_v4 = vld [vmem:[#allocation2 + $0xf28] sm:$0xff]  ;;  %v558_v5 = vld [vmem:[#allocation2 + $0xf18] sm:$0xff] }
 0x11f   :  { %1717 = vmatprep.subr.bf16.mxu1 %v1716_v11  ;;  %v517_v11 = vld [vmem:[#allocation2 + $0xdd0] sm:$0xff]  ;;  %v1496_v60 = vpack.c.bf16 %v552_v56, %v548_v55  ;;  %v551_v62 = vld [vmem:[#allocation2 + $0xee0] sm:$0xff] }
 0x120   :  { %v585_v55 = vld [vmem:[#allocation2 + $0xff0] sm:$0xff] }
 0x121   :  { %1463 = vmatpush1.bf16.msra.mxu0 %v1462_v17  ;;  %v530_v17 = vld [vmem:[#allocation2 + $0xe38] sm:$0xff] }
 0x122   :  { %1719 = vmatpush1.bf16.msra.mxu1 %v1718_v18  ;;  %1465 = vmatprep.subr.bf16.mxu0 %v1464_v19  ;;  %v1482_v18 = vpack.c.bf16 %v519_v9, %v515_v8  ;;  %v1738_v19 = vpack.c.bf16 %v521_v13, %v517_v11  ;;  %v1740_v25 = vpack.c.bf16 %v530_v17, %v526_v16  ;;  %v555_v9 = vld [vmem:[#allocation2 + $0xf00] sm:$0xff]  ;;  %v568_v16 = vld [vmem:[#allocation2 + $0xf68] sm:$0xff]  ;;  %v566_v17 = vld [vmem:[#allocation2 + $0xf58] sm:$0xff] }
 0x123   :  { %1721 = vmatprep.subr.bf16.mxu1 %v1720_v24  ;;  %v525_v24 = vld [vmem:[#allocation2 + $0xe10] sm:$0xff]  ;;  %v1500_v8 = vpack.c.bf16 %v560_v4, %v556_v3  ;;  %v559_v11 = vld [vmem:[#allocation2 + $0xf20] sm:$0xff] }
 0x125   :  { %1467 = vmatpush1.bf16.msra.mxu0 %v1466_v31  ;;  %v538_v31 = vld [vmem:[#allocation2 + $0xe78] sm:$0xff] }
 0x126   :  { %1723 = vmatpush1.bf16.msra.mxu1 %v1722_v32  ;;  %1469 = vmatprep.subr.bf16.mxu0 %v1468_v33  ;;  %v1486_v32 = vpack.c.bf16 %v527_v23, %v523_v22  ;;  %v1742_v33 = vpack.c.bf16 %v529_v26, %v525_v24  ;;  %v1744_v40 = vpack.c.bf16 %v538_v31, %v534_v30  ;;  %v563_v23 = vld [vmem:[#allocation2 + $0xf40] sm:$0xff]  ;;  %v576_v30 = vld [vmem:[#allocation2 + $0xfa8] sm:$0xff]  ;;  %v574_v31 = vld [vmem:[#allocation2 + $0xf98] sm:$0xff] }
 0x127   :  { %1725 = vmatprep.subr.bf16.mxu1 %v1724_v39  ;;  %v533_v39 = vld [vmem:[#allocation2 + $0xe50] sm:$0xff]  ;;  %v1504_v22 = vpack.c.bf16 %v568_v16, %v564_v15  ;;  %v567_v24 = vld [vmem:[#allocation2 + $0xf60] sm:$0xff] }
 0x129   :  { %1471 = vmatpush1.bf16.msra.mxu0 %v1470_v45  ;;  %v546_v45 = vld [vmem:[#allocation2 + $0xeb8] sm:$0xff] }
 0x12a   :  { %1727 = vmatpush1.bf16.msra.mxu1 %v1726_v46  ;;  %1473 = vmatprep.subr.bf16.mxu0 %v1472_v47  ;;  %v1490_v46 = vpack.c.bf16 %v535_v38, %v531_v36  ;;  %v1746_v47 = vpack.c.bf16 %v537_v41, %v533_v39  ;;  %v1748_v53 = vpack.c.bf16 %v546_v45, %v542_v44  ;;  %v571_v38 = vld [vmem:[#allocation2 + $0xf80] sm:$0xff]  ;;  %v584_v44 = vld [vmem:[#allocation2 + $0xfe8] sm:$0xff]  ;;  %v582_v45 = vld [vmem:[#allocation2 + $0xfd8] sm:$0xff] }
 0x12b   :  { %1729 = vmatprep.subr.bf16.mxu1 %v1728_v52  ;;  %v541_v52 = vld [vmem:[#allocation2 + $0xe90] sm:$0xff]  ;;  %v1508_v36 = vpack.c.bf16 %v576_v30, %v572_v28  ;;  %v575_v39 = vld [vmem:[#allocation2 + $0xfa0] sm:$0xff] }
 0x12d   :  { %1475 = vmatpush1.bf16.msra.mxu0 %v1474_v37  ;;  %v554_v37 = vld [vmem:[#allocation2 + $0xef8] sm:$0xff] }
 0x12e   :  { %1731 = vmatpush1.bf16.msra.mxu1 %v1730_v58  ;;  %1477 = vmatprep.subr.bf16.mxu0 %v1476_v59  ;;  %v1494_v58 = vpack.c.bf16 %v543_v51, %v539_v50  ;;  %v1750_v59 = vpack.c.bf16 %v545_v54, %v541_v52  ;;  %v1752_v1 = vpack.c.bf16 %v554_v37, %v550_v57  ;;  %v579_v51 = vld [vmem:[#allocation2 + $0xfc0] sm:$0xff]  ;;  %v581_v54 = vld [vmem:[#allocation2 + $0xfd0] sm:$0xff]  ;;  %v35_v37 = vadd.s32 768, %v1893_v10 }
 0x12f   :  { %1733 = vmatprep.subr.bf16.mxu1 %v1732_v0  ;;  %v549_v0 = vld [vmem:[#allocation2 + $0xed0] sm:$0xff]  ;;  %v1512_v50 = vpack.c.bf16 %v584_v44, %v580_v43  ;;  %v583_v52 = vld [vmem:[#allocation2 + $0xfe0] sm:$0xff]  ;;  %v1770_v57 = vpack.c.bf16 %v585_v55, %v581_v54 }
 0x130   :  { %v1514_v56 = vpack.c.bf16 %v583_v52, %v579_v51  ;;  %vm49_vm13 = vcmp.eq.s32.totalorder %v35_v37, %v1896_v20  ;;  %vm57_vm15 = vcmp.eq.s32.totalorder %v35_v37, %v1905_v34 }
 0x131   :  { %1479 = vmatpush1.bf16.msra.mxu0 %v1478_v49  ;;  %v562_v49 = vld [vmem:[#allocation2 + $0xf38] sm:$0xff] }
 0x132   :  { %1735 = vmatpush1.bf16.msra.mxu1 %v1734_v6  ;;  %1481 = vmatprep.subr.bf16.mxu0 %v1480_v7  ;;  %v1498_v6 = vpack.c.bf16 %v551_v62, %v547_v61  ;;  %v1754_v7 = vpack.c.bf16 %v553_v2, %v549_v0  ;;  %v1756_v13 = vpack.c.bf16 %v562_v49, %v558_v5 }
 0x133   :  { %1737 = vmatprep.subr.bf16.mxu1 %v1736_v12  ;;  %v557_v12 = vld [vmem:[#allocation2 + $0xf10] sm:$0xff] }
 0x135   :  { %1483 = vmatpush1.bf16.msra.mxu0 %v1482_v18  ;;  %v570_v18 = vld [vmem:[#allocation2 + $0xf78] sm:$0xff] }
 0x136   :  { %1739 = vmatpush1.bf16.msra.mxu1 %v1738_v19  ;;  %1485 = vmatprep.subr.bf16.mxu0 %v1484_v21  ;;  %v1502_v19 = vpack.c.bf16 %v559_v11, %v555_v9  ;;  %v1758_v21 = vpack.c.bf16 %v561_v14, %v557_v12  ;;  %v1760_v26 = vpack.c.bf16 %v570_v18, %v566_v17 }
 0x137   :  { %1741 = vmatprep.subr.bf16.mxu1 %v1740_v25  ;;  %v565_v25 = vld [vmem:[#allocation2 + $0xf50] sm:$0xff] }
 0x139   :  { %1487 = vmatpush1.bf16.msra.mxu0 %v1486_v32  ;;  %v578_v32 = vld [vmem:[#allocation2 + $0xfb8] sm:$0xff] }
 0x13a   :  { %1743 = vmatpush1.bf16.msra.mxu1 %v1742_v33  ;;  %1489 = vmatprep.subr.bf16.mxu0 %v1488_v35  ;;  %v1506_v33 = vpack.c.bf16 %v567_v24, %v563_v23  ;;  %v1762_v35 = vpack.c.bf16 %v569_v27, %v565_v25  ;;  %v1764_v41 = vpack.c.bf16 %v578_v32, %v574_v31 }
 0x13b   :  { %1745 = vmatprep.subr.bf16.mxu1 %v1744_v40  ;;  %v573_v40 = vld [vmem:[#allocation2 + $0xf90] sm:$0xff] }
 0x13d   :  { %1491 = vmatpush1.bf16.msra.mxu0 %v1490_v46  ;;  %v586_v46 = vld [vmem:[#allocation2 + $0xff8] sm:$0xff] }
 0x13e   :  { %1747 = vmatpush1.bf16.msra.mxu1 %v1746_v47  ;;  %1493 = vmatprep.subr.bf16.mxu0 %v1492_v48  ;;  %v1510_v47 = vpack.c.bf16 %v575_v39, %v571_v38  ;;  %v1766_v48 = vpack.c.bf16 %v577_v42, %v573_v40 }
 0x13f   :  { %1749 = vmatprep.subr.bf16.mxu1 %v1748_v53  ;;  %v1768_v53 = vpack.c.bf16 %v586_v46, %v582_v45 }
 0x141   :  { %1495 = vmatpush1.bf16.msra.mxu0 %v1494_v58 }
 0x142   :  { %1751 = vmatpush1.bf16.msra.mxu1 %v1750_v59  ;;  %1497 = vmatprep.subr.bf16.mxu0 %v1496_v60 }
 0x143   :  { %1753 = vmatprep.subr.bf16.mxu1 %v1752_v1 }
 0x145   :  { %1499 = vmatpush1.bf16.msra.mxu0 %v1498_v6 }
 0x146   :  { %1755 = vmatpush1.bf16.msra.mxu1 %v1754_v7  ;;  %1501 = vmatprep.subr.bf16.mxu0 %v1500_v8 }
 0x147   :  { %1757 = vmatprep.subr.bf16.mxu1 %v1756_v13 }
 0x149   :  { %1503 = vmatpush1.bf16.msra.mxu0 %v1502_v19 }
 0x14a   :  { %1759 = vmatpush1.bf16.msra.mxu1 %v1758_v21  ;;  %1505 = vmatprep.subr.bf16.mxu0 %v1504_v22 }
 0x14b   :  { %1761 = vmatprep.subr.bf16.mxu1 %v1760_v26 }
 0x14d   :  { %1507 = vmatpush1.bf16.msra.mxu0 %v1506_v33 }
 0x14e   :  { %1763 = vmatpush1.bf16.msra.mxu1 %v1762_v35  ;;  %1509 = vmatprep.subr.bf16.mxu0 %v1508_v36 }
 0x14f   :  { %1765 = vmatprep.subr.bf16.mxu1 %v1764_v41 }
 0x151   :  { %1511 = vmatpush1.bf16.msra.mxu0 %v1510_v47 }
 0x152   :  { %1767 = vmatpush1.bf16.msra.mxu1 %v1766_v48  ;;  %1513 = vmatprep.subr.bf16.mxu0 %v1512_v50 }
 0x153   :  { %1769 = vmatprep.subr.bf16.mxu1 %v1768_v53 }
 0x155   :  { %1515 = vmatpush1.bf16.msra.mxu0 %v1514_v56 }
 0x156   :  { %1771 = vmatpush1.bf16.msra.mxu1 %v1770_v57 }
 0x158   :  { %1241 = vmatmul.mubr.msk.f32.vlgmr.msra.gmra.mrb[0].mxu0 %vm49_vm13, %v1855_v29 }
 0x159   :  { %1257 = vmatmul.mubr.msk.f32.vlgmr.msra.gmra.mrb[0].mxu1 %vm49_vm13, %v1855_v29  ;;  %1242 = vmatprep.mubr.msk.f32.mxu0 %vm58_vm14, %v1855_v29 }
 0x15a   :  { %1258 = vmatprep.mubr.msk.f32.mxu1 %vm58_vm14, %v1855_v29 }
 0x15c   :  { %1243 = vmatmul.mubr.msk.f32.gmra.mrb[2].mxu0 %vm57_vm15, %v1855_v29 }
 0x15d   :  { %1259 = vmatmul.mubr.msk.f32.gmra.mrb[2].mxu1 %vm57_vm15, %v1855_v29 }
 0x22b   :  { %v884_v10 = vpop.f32.mrb[0].mxu0 }
 0x22c   :  { %1203 = vst [vmem:[#allocation5] sm:$0xff] %v884_v10  ;;  %v1192_v20 = vpop.f32.mrb[0].mxu1  ;;  %v886_v58 = vpop.f32.mrb[1].mxu0 }
 0x22d   :  { %1205 = vst [vmem:[#allocation5 + $0x10] sm:$0xff] %v1192_v20  ;;  %1204 = vst [vmem:[#allocation5 + $0x8] sm:$0xff] %v886_v58  ;;  %v1194_v59 = vpop.f32.mrb[1].mxu1 }
 0x22e   :  { %1206 = vst [vmem:[#allocation5 + $0x18] sm:$0xff] %v1194_v59 }
 0x22f   :  { %v890_v63 = vpop.f32.mrb[2].mxu0 }
 0x230   :  { %1207 = vst [vmem:[#allocation5 + $0x20] sm:$0xff] %v890_v63  ;;  %v1198_v60 = vpop.f32.mrb[2].mxu1  ;;  %v892_v61 = vpop.f32.mrb[3].mxu0 }
 0x231   :  { %1209 = vst [vmem:[#allocation5 + $0x30] sm:$0xff] %v1198_v60  ;;  %1208 = vst [vmem:[#allocation5 + $0x28] sm:$0xff] %v892_v61  ;;  %v1200_v34 = vpop.f32.mrb[3].mxu1 }
 0x232   :  { %1210 = vst [vmem:[#allocation5 + $0x38] sm:$0xff] %v1200_v34 }
 0x233   :  { %1836 = shalt.err (!%p1833_p12)
}
 0x234   :  { %s1837_s30 = scalar_lea.hbm %s1985_s2, 1024 }
 0x235   :  { %p1838_p13 = scmp.ne.s32.totalorder %s1985_s2, %s1837_s30  ;;  %p1841_p0 = scmp.lt.u32.totalorder %s1837_s30, %s1985_s2 }
 0x237   :  { %p1843_p1 = pnand %p1841_p0, %p1838_p13 }
 0x239   :  { %1846 = shalt.err (!%p1843_p1)
}
 0x23a   :  { %1222 = dma.vmem_to_hbm [thread:$0]  %s1217_s1, 1024, %s1985_s2, [#allocation4], %s1852_s19, %s1852_s19, %s1853_s20  }
 0x23b   :  { %1849 = dma.done.wait [#allocation4], 1024  }
 0x23c   :  { %1850 = vsyncadd [#allocation4], 4294966272 }
 0x23d   :  { %1226 = vsyncpa [#allocation3], 1 }
 0x23e   :  { %1227 = vsyncpa [#allocation4], 1 }

</bundles_post_ra>
